<compile_context>
chip_gen: v5e
topology: v5e:2x2
jax: 0.10.0
libtpu: 0.0.40
codegen_flags: <defaults>
</compile_context>

<pallas_src>
import jax
import jax.numpy as jnp
from jax import lax
from jax.experimental import pallas as pl
from jax.experimental.pallas import tpu as pltpu


def _round_up(x, m):
    return (x + m - 1) // m * m


# ----------------------------------------------------------------------------- kernel
def _make_kernel(*, E, VOCAB, H, T_pad, TN, S, V, VP, SR, SRP, ND, NDP, A, AP,
                 S_pad, emit_members):
    o_req = S * VP
    o_dom = o_req + SRP
    o_act = o_dom + NDP
    inv_e = 1.0 / float(E)
    TNT = TN * T_pad

    def kernel(ids_ref, table_ref, mask_ref, w_enc_ref, b_enc_ref, w_pool_ref,
               b_pool_ref, w_heads_ref, *refs):
        if emit_members:
            mean_ref, mi_ref, member_ref, emb_vmem, ent_acc = refs
        else:
            mean_ref, mi_ref, emb_vmem, ent_acc = refs
            member_ref = None

        n = pl.program_id(0)
        e = pl.program_id(1)

        # ---- in-kernel embedding gather (ids in SMEM, table VMEM-resident) ----
        # TODO(synk): for production vocab sizes keep the table in HBM
        # (memory_space=pl.ANY) and batch DMA-gather rows instead.
        base = n * TNT

        @pl.loop(0, TNT)
        def _gather(i):
            tok = ids_ref[base + i]
            emb_vmem[i] = table_ref[e * VOCAB + tok]

        # ---- encoder: one fused [TN*T, H] x [H, H] bf16 matmul + GELU ---------
        x = emb_vmem[...].astype(jnp.bfloat16)
        h = jnp.dot(x, w_enc_ref[e], preferred_element_type=jnp.float32) + b_enc_ref[e]
        h = 0.5 * h * (1.0 + jnp.tanh(0.7978845608028654 *
                                      (h + 0.044715 * h * h * h)))   # GELU (tanh approx)
        h3 = h.reshape(TN, T_pad, H)
        mask = mask_ref[...]                                 # [TN, T_pad] f32
        h0 = h3[:, 0, :]                                     # UNMASKED [CLS] -> pooler
        turn_sum = jnp.sum(h3 * mask[:, :, None], axis=1)    # masked mean pooling
        denom = jnp.maximum(jnp.sum(mask, axis=-1, keepdims=True), 1.0)
        turn_repr = turn_sum / denom                         # exact division (feeds outputs)
        pooled = jnp.tanh(jnp.dot(h0.astype(jnp.bfloat16), w_pool_ref[e],
                                  preferred_element_type=jnp.float32) + b_pool_ref[e])
        feat = (turn_repr + pooled).astype(jnp.bfloat16)     # [TN, H]

        # ---- all prediction heads in one lane-dense matmul ---------------------
        logits = jnp.dot(feat, w_heads_ref[...],
                         preferred_element_type=jnp.float32)          # [TN, W_pad] f32

        @pl.when(e == 0)
        def _init():
            mean_ref[...] = jnp.zeros_like(mean_ref)
            ent_acc[...] = jnp.zeros_like(ent_acc)

        lane = lax.broadcasted_iota(jnp.int32, (1, VP), 1)
        vmask = lane < V
        slot_lane = lax.broadcasted_iota(jnp.int32, (1, S_pad), 1)
        ent_val = jnp.zeros((TN, S_pad), jnp.float32)

        # per-slot belief softmax (lane-aligned segments) + per-member entropy
        for s in range(S):
            lo = s * VP
            seg = jnp.where(vmask, logits[:, lo:lo + VP], -1e30)
            m = jnp.max(seg, axis=-1, keepdims=True)
            ex = jnp.exp(seg - m)
            probs = ex / jnp.sum(ex, axis=-1, keepdims=True)          # exact division
            mean_ref[:, lo:lo + VP] += probs
            if emit_members:
                member_ref[:, lo:lo + VP] = probs
            # MI branch: matches torch in-place `slot_probs += 1e-8` + renormalize
            eps = jnp.where(vmask, probs + 1e-8, 1.0)
            ssum = jnp.sum(jnp.where(vmask, eps, 0.0), axis=-1, keepdims=True)
            lp = jnp.log(eps) - jnp.log(ssum)
            pe = eps * pl.reciprocal(ssum, approx=True)               # MI-only: approx ok
            ent_s = -jnp.sum(jnp.where(vmask, pe * lp, 0.0), axis=-1, keepdims=True)
            ent_val = ent_val + ent_s * (slot_lane == s).astype(jnp.float32)

        ent_acc[...] += ent_val                                       # one lane-dense store

        req = jax.nn.sigmoid(logits[:, o_req:o_req + SRP])
        dom = jax.nn.sigmoid(logits[:, o_dom:o_dom + NDP])
        alane = lax.broadcasted_iota(jnp.int32, (1, AP), 1)
        aseg = jnp.where(alane < A, logits[:, o_act:o_act + AP], -1e30)
        aex = jnp.exp(aseg - jnp.max(aseg, axis=-1, keepdims=True))
        act = aex / jnp.sum(aex, axis=-1, keepdims=True)              # exact division

        mean_ref[:, o_req:o_req + SRP] += req
        mean_ref[:, o_dom:o_dom + NDP] += dom
        mean_ref[:, o_act:o_act + AP] += act
        if emit_members:
            member_ref[:, o_req:o_req + SRP] = req
            member_ref[:, o_dom:o_dom + NDP] = dom
            member_ref[:, o_act:o_act + AP] = act

        @pl.when(e == E - 1)
        def _finalize():
            mean_vals = mean_ref[...] * inv_e                         # ensemble mean
            mean_ref[...] = mean_vals
            mi_val = jnp.zeros((TN, S_pad), jnp.float32)
            for s in range(S):
                lo = s * VP
                mb = jnp.where(vmask, mean_vals[:, lo:lo + VP] + 1e-8, 1.0)
                msum = jnp.sum(jnp.where(vmask, mb, 0.0), axis=-1, keepdims=True)
                mlp = jnp.log(mb) - jnp.log(msum)
                mp = mb * pl.reciprocal(msum, approx=True)            # MI-only: approx ok
                tot = -jnp.sum(jnp.where(vmask, mp * mlp, 0.0), axis=-1, keepdims=True)
                mi_val = mi_val + tot * (slot_lane == s).astype(jnp.float32)
            mi_ref[...] = mi_val - ent_acc[...] * inv_e               # MI = H(mean)-mean(H)

    return kernel


# ----------------------------------------------------------------------------- params
def init_params(key, ensemble_size, vocab, hidden, n_slots, n_values,
                n_req_slots, n_domains, n_acts):
    keys = jax.random.split(key, 9)

    def nrm(k, shape, scale=0.05):
        return (scale * jax.random.normal(k, shape)).astype(jnp.float32)

    return dict(
        embed=nrm(keys[0], (ensemble_size, vocab, hidden)),
        w_enc=nrm(keys[1], (ensemble_size, hidden, hidden)),
        b_enc=nrm(keys[2], (ensemble_size, 1, hidden)),
        w_pool=nrm(keys[3], (ensemble_size, hidden, hidden)),
        b_pool=nrm(keys[4], (ensemble_size, 1, hidden)),
        w_bel=nrm(keys[5], (ensemble_size, n_slots, hidden, n_values)),
        w_req=nrm(keys[6], (ensemble_size, hidden, n_req_slots)),
        w_dom=nrm(keys[7], (ensemble_size, hidden, n_domains)),
        w_act=nrm(keys[8], (ensemble_size, hidden, n_acts)),
    )


def prepare_params(params):
    """One-time (per-checkpoint) packing of weights into kernel layouts.

    Hoisted out of the per-call forward so the fused head weight / bf16 casts
    are not rebuilt and rewritten to HBM on every inference call.
    """
    E, VOCAB, H = params["embed"].shape
    S, V = params["w_bel"].shape[1], params["w_bel"].shape[3]
    SR = params["w_req"].shape[2]
    ND = params["w_dom"].shape[2]
    A = params["w_act"].shape[2]
    VP, SRP, NDP, AP = (_round_up(v, 128) for v in (V, SR, ND, A))
    S_pad = _round_up(S, 128)
    W_pad = S * VP + SRP + NDP + AP

    # Fused, per-segment lane-padded head weight: [H, slot0|slot1|...|req|dom|act]
    w_bel = jnp.transpose(params["w_bel"], (0, 2, 1, 3))          # [E, H, S, V]
    w_heads = jnp.zeros((E, H, W_pad), jnp.float32)
    for s in range(S):
        w_heads = w_heads.at[:, :, s * VP:s * VP + V].set(w_bel[:, :, s, :])
    o_req = S * VP
    o_dom = o_req + SRP
    o_act = o_dom + NDP
    w_heads = w_heads.at[:, :, o_req:o_req + SR].set(params["w_req"])
    w_heads = w_heads.at[:, :, o_dom:o_dom + ND].set(params["w_dom"])
    w_heads = w_heads.at[:, :, o_act:o_act + A].set(params["w_act"])

    return dict(
        table=params["embed"].reshape(E * VOCAB, H).astype(jnp.float32),
        w_enc=params["w_enc"].astype(jnp.bfloat16),
        b_enc=params["b_enc"].astype(jnp.float32),
        w_pool=params["w_pool"].astype(jnp.bfloat16),
        b_pool=params["b_pool"].astype(jnp.float32),
        w_heads=w_heads.astype(jnp.bfloat16),
        cfg=dict(E=E, VOCAB=VOCAB, H=H, S=S, V=V, VP=VP, SR=SR, SRP=SRP,
                 ND=ND, NDP=NDP, A=A, AP=AP, S_pad=S_pad, W_pad=W_pad),
    )


# ----------------------------------------------------------------------------- sizing
def _vmem_limit_bytes():
    cap = 128 * 1024 * 1024
    try:
        cap = int(pltpu.get_tpu_info().vmem_capacity_bytes)
    except Exception:
        pass
    # ~100 MiB on 128 MiB parts (v5e/v6e), ~48 MiB on 64 MiB parts (v7x).
    return max(32 * 1024 * 1024, min(100 * 1024 * 1024, cap - 16 * 1024 * 1024))


def _pick_row_tile(N):
    n8 = _round_up(max(N, 1), 8)
    tn = min(256, n8)                 # fill the MXU M-dim / amortize grid-step overhead
    multi_core = False
    try:
        kind = jax.devices()[0].device_kind.lower()
        multi_core = any(t in kind for t in ("v7", "v5p", "v4"))
    except Exception:
        pass
    if multi_core and n8 >= 16 and n8 <= tn:
        tn = _round_up((n8 + 1) // 2, 8)   # expose >=2 parallel tiles for 2-TC chips
    n_pad = _round_up(n8, tn)
    return tn, n_pad


# ----------------------------------------------------------------------------- forward
def ensemble_setsumbt_forward(prepared, input_ids, attention_mask, reduction="mean"):
    if reduction not in ("mean", "none"):
        raise NameError("Not Implemented!")

    cfg = prepared["cfg"]
    E, VOCAB, H = cfg["E"], cfg["VOCAB"], cfg["H"]
    S, V, VP = cfg["S"], cfg["V"], cfg["VP"]
    SR, SRP = cfg["SR"], cfg["SRP"]
    ND, NDP = cfg["ND"], cfg["NDP"]
    A, AP = cfg["A"], cfg["AP"]
    S_pad, W_pad = cfg["S_pad"], cfg["W_pad"]

    B, Dlg, T = input_ids.shape
    N = B * Dlg
    T_pad = _round_up(T, 8)                 # sublane alignment for the [TN, T, H] reshape
    TN, N_pad = _pick_row_tile(N)

    ids = jnp.pad(input_ids.reshape(N, T).astype(jnp.int32),
                  ((0, N_pad - N), (0, T_pad - T)))
    mask = jnp.pad(attention_mask.reshape(N, T).astype(jnp.float32),
                   ((0, N_pad - N), (0, T_pad - T)))
    ids_flat = ids.reshape(N_pad * T_pad)   # scalar-prefetched token ids (SMEM)

    emit_members = (reduction == "none")
    kernel = _make_kernel(E=E, VOCAB=VOCAB, H=H, T_pad=T_pad, TN=TN, S=S, V=V,
                          VP=VP, SR=SR, SRP=SRP, ND=ND, NDP=NDP, A=A, AP=AP,
                          S_pad=S_pad, emit_members=emit_members)

    out_shape = [jax.ShapeDtypeStruct((N_pad, W_pad), jnp.float32),   # ensemble-mean heads
                 jax.ShapeDtypeStruct((N_pad, S_pad), jnp.float32)]   # belief-state MI
    out_specs = [pl.BlockSpec((TN, W_pad), lambda n, e, _ids: (n, 0)),
                 pl.BlockSpec((TN, S_pad), lambda n, e, _ids: (n, 0))]
    if emit_members:
        out_shape.append(jax.ShapeDtypeStruct((E, N_pad, W_pad), jnp.float32))
        out_specs.append(pl.BlockSpec((None, TN, W_pad), lambda n, e, _ids: (e, n, 0)))

    # TODO(synk): for very wide W_pad (many slots/values) add a third grid axis tiling
    # the head width (slot-group aligned) so the streamed w_heads block + f32 output
    # accumulator fit v7x's 64 MiB VMEM.
    grid_spec = pltpu.PrefetchScalarGridSpec(
        num_scalar_prefetch=1,
        grid=(N_pad // TN, E),
        in_specs=[
            # embedding table, VMEM-resident across the whole grid (constant index_map)
            pl.BlockSpec((E * VOCAB, H), lambda n, e, _ids: (0, 0)),
            pl.BlockSpec((TN, T_pad), lambda n, e, _ids: (n, 0)),           # attention mask
            # encoder / pooler weights: load once, index [e] inside the kernel
            pl.BlockSpec((E, H, H), lambda n, e, _ids: (0, 0, 0)),          # w_enc
            pl.BlockSpec((E, 1, H), lambda n, e, _ids: (0, 0, 0)),          # b_enc
            pl.BlockSpec((E, H, H), lambda n, e, _ids: (0, 0, 0)),          # w_pool
            pl.BlockSpec((E, 1, H), lambda n, e, _ids: (0, 0, 0)),          # b_pool
            # fused head weight: streamed per ensemble member (double-buffered)
            pl.BlockSpec((None, H, W_pad), lambda n, e, _ids: (e, 0, 0)),
        ],
        out_specs=tuple(out_specs),
        scratch_shapes=[pltpu.VMEM((TN * T_pad, H), jnp.float32),   # gathered embeddings
                        pltpu.VMEM((TN, S_pad), jnp.float32)],      # entropy accumulator
    )

    outs = pl.pallas_call(
        kernel,
        out_shape=tuple(out_shape),
        grid_spec=grid_spec,
        compiler_params=pltpu.CompilerParams(
            dimension_semantics=("parallel", "arbitrary"),
            vmem_limit_bytes=_vmem_limit_bytes()),
    )(ids_flat, prepared["table"], mask, prepared["w_enc"], prepared["b_enc"],
      prepared["w_pool"], prepared["b_pool"], prepared["w_heads"])

    mean_out, mi_out = outs[0], outs[1]

    o_req = S * VP
    o_dom = o_req + SRP
    o_act = o_dom + NDP

    mi = mi_out[:N, :S]
    belief_state_mutual_information = {f"slot_{s}": mi[:, s].reshape(B, Dlg)
                                       for s in range(S)}

    if reduction == "mean":
        mh = mean_out[:N]
        belief_state = {f"slot_{s}": mh[:, s * VP:s * VP + V].reshape(B, Dlg, V)
                        for s in range(S)}
        request_probabilities = {f"req_slot_{i}": mh[:, o_req + i].reshape(B, Dlg)
                                 for i in range(SR)}
        active_domain_probabilities = {f"domain_{d}": mh[:, o_dom + d].reshape(B, Dlg)
                                       for d in range(ND)}
        general_act_probabilities = mh[:, o_act:o_act + A].reshape(B, Dlg, A)
    else:  # reduction == "none": ensemble axis at -2 (belief/act), -1 (request/domain)
        mem = outs[2][:, :N, :]
        belief_state = {
            f"slot_{s}": jnp.transpose(mem[:, :, s * VP:s * VP + V], (1, 0, 2)).reshape(B, Dlg, E, V)
            for s in range(S)}
        request_probabilities = {
            f"req_slot_{i}": jnp.transpose(mem[:, :, o_req + i], (1, 0)).reshape(B, Dlg, E)
            for i in range(SR)}
        active_domain_probabilities = {
            f"domain_{d}": jnp.transpose(mem[:, :, o_dom + d], (1, 0)).reshape(B, Dlg, E)
            for d in range(ND)}
        general_act_probabilities = jnp.transpose(mem[:, :, o_act:o_act + A],
                                                  (1, 0, 2)).reshape(B, Dlg, E, A)

    # TODO(synk): per-member NLL loss needs state/request/domain/act labels; none are
    # passed here so we follow the PyTorch `loss = None` path.
    return dict(
        loss=None,
        belief_state=belief_state,
        request_probabilities=request_probabilities,
        active_domain_probabilities=active_domain_probabilities,
        general_act_probabilities=general_act_probabilities,
        belief_state_mutual_information=belief_state_mutual_information,
    )


if __name__ == "__main__":
    key = jax.random.PRNGKey(0)
    k_ids, k_len, k_par = jax.random.split(key, 3)

    # small synthetic config
    B, Dlg, T = 2, 3, 8          # batch, dialogue turns, tokens per turn
    VOCAB, H = 64, 32            # vocab, hidden size
    E = 3                        # ensemble_size
    S, V = 2, 8                  # informable slots, values per slot
    SR, ND, A = 2, 2, 3          # requestable slots, domains, general act classes

    input_ids = jax.random.randint(k_ids, (B, Dlg, T), 0, VOCAB, dtype=jnp.int32)
    lengths = jax.random.randint(k_len, (B, Dlg, 1), 3, T + 1, dtype=jnp.int32)
    attention_mask = (jnp.arange(T, dtype=jnp.int32)[None, None, :] < lengths).astype(jnp.int32)

    params = init_params(k_par, E, VOCAB, H, S, V, SR, ND, A)
    prepared = prepare_params(params)   # one-time weight packing, hoisted out of forward

    out_mean = ensemble_setsumbt_forward(prepared, input_ids, attention_mask, reduction="mean")
    jax.block_until_ready(out_mean)
    out_none = ensemble_setsumbt_forward(prepared, input_ids, attention_mask, reduction="none")
    jax.block_until_ready(out_none)
    print("KERNEL_OK")
</pallas_src>

<mosaic_0001>
module attributes {stable_mosaic.version = 11 : i64} {
  func.func @kernel(%arg0: i32, %arg1: i32, %arg2: memref<64xi32, #tpu.memory_space<smem>>, %arg3: memref<192x32xf32, #tpu.memory_space<vmem>>, %arg4: memref<8x8xf32, #tpu.memory_space<vmem>>, %arg5: memref<3x32x32xbf16, #tpu.memory_space<vmem>>, %arg6: memref<3x1x32xf32, #tpu.memory_space<vmem>>, %arg7: memref<3x32x32xbf16, #tpu.memory_space<vmem>>, %arg8: memref<3x1x32xf32, #tpu.memory_space<vmem>>, %arg9: memref<1x32x640xbf16, #tpu.memory_space<vmem>>, %arg10: memref<8x640xf32, #tpu.memory_space<vmem>>, %arg11: memref<8x128xf32, #tpu.memory_space<vmem>>, %arg12: memref<64x32xf32, #tpu.memory_space<vmem>>, %arg13: memref<8x128xf32, #tpu.memory_space<vmem>>) attributes {dimension_semantics = [#tpu.dimension_semantics<parallel>, #tpu.dimension_semantics<arbitrary>], iteration_bounds = array<i64: 1, 3>, scalar_prefetch = 1 : i64, scratch_operands = 2 : i64, tpu.core_type = #tpu.core_type<tc>, window_params = [{pipeline_mode = #tpu.pipeline_mode<synchronous>, transform_indices = @transform_0, window_bounds = array<i64: 192, 32>}, {transform_indices = @transform_1, window_bounds = array<i64: 8, 8>}, {pipeline_mode = #tpu.pipeline_mode<synchronous>, transform_indices = @transform_2, window_bounds = array<i64: 3, 32, 32>}, {pipeline_mode = #tpu.pipeline_mode<synchronous>, transform_indices = @transform_3, window_bounds = array<i64: 3, 1, 32>}, {pipeline_mode = #tpu.pipeline_mode<synchronous>, transform_indices = @transform_4, window_bounds = array<i64: 3, 32, 32>}, {pipeline_mode = #tpu.pipeline_mode<synchronous>, transform_indices = @transform_5, window_bounds = array<i64: 3, 1, 32>}, {transform_indices = @transform_6, window_bounds = array<i64: 1, 32, 640>}, {transform_indices = @transform_7, window_bounds = array<i64: 8, 640>}, {transform_indices = @transform_8, window_bounds = array<i64: 8, 128>}]} {
    %c64_i32 = arith.constant 64 : i32
    %0 = arith.muli %arg0, %c64_i32 : i32
    %c0_i32 = arith.constant 0 : i32
    %c64_i32_0 = arith.constant 64 : i32
    %1 = arith.addi %c0_i32, %c64_i32_0 : i32
    %c1_i32 = arith.constant 1 : i32
    scf.for %arg14 = %c0_i32 to %1 step %c1_i32  : i32 {
      %c1_i32_76 = arith.constant 1 : i32
      %214 = arith.muli %arg14, %c1_i32_76 : i32
      %c0_i32_77 = arith.constant 0 : i32
      %215 = arith.addi %c0_i32_77, %214 : i32
      %216 = arith.addi %0, %215 : i32
      %217 = arith.index_cast %216 : i32 to index
      %218 = memref.load %arg2[%217] : memref<64xi32, #tpu.memory_space<smem>>
      %c64_i32_78 = arith.constant 64 : i32
      %219 = arith.muli %arg1, %c64_i32_78 : i32
      %220 = arith.addi %219, %218 : i32
      %221 = arith.index_cast %220 : i32 to index
      %c0_79 = arith.constant 0 : index
      %222 = vector.load %arg3[%221, %c0_79] : memref<192x32xf32, #tpu.memory_space<vmem>>, vector<1x32xf32>
      %223 = vector.shape_cast %222 : vector<1x32xf32> to vector<32xf32>
      %224 = arith.index_cast %215 : i32 to index
      %c0_80 = arith.constant 0 : index
      %225 = vector.load %arg12[%224, %c0_80] : memref<64x32xf32, #tpu.memory_space<vmem>>, vector<1x32xf32>
      %226 = vector.shape_cast %225 : vector<1x32xf32> to vector<32xf32>
      %227 = vector.shape_cast %223 : vector<32xf32> to vector<1x32xf32>
      tpu.vector_store %arg12[%224, %c0_80], %227 {strides = array<i32>} : memref<64x32xf32, #tpu.memory_space<vmem>>, vector<1x32xf32>,
    }
    %c64_i32_1 = arith.constant 64 : i32
    %c0 = arith.constant 0 : index
    %c0_2 = arith.constant 0 : index
    %2 = vector.load %arg12[%c0, %c0_2] : memref<64x32xf32, #tpu.memory_space<vmem>>, vector<64x32xf32>
    %3 = arith.truncf %2 : vector<64x32xf32> to vector<64x32xbf16>
    %4 = arith.index_cast %arg1 : i32 to index
    %c0_3 = arith.constant 0 : index
    %c0_4 = arith.constant 0 : index
    %5 = vector.load %arg5[%4, %c0_3, %c0_4] : memref<3x32x32xbf16, #tpu.memory_space<vmem>>, vector<1x32x32xbf16>
    %6 = vector.shape_cast %5 : vector<1x32x32xbf16> to vector<32x32xbf16>
    %cst = arith.constant dense<0.000000e+00> : vector<64x32xf32>
    %7 = tpu.matmul %3, %6, %cst {dimension_numbers = #tpu.dot_dimension_numbers<[1], [0], [0], [1], [0, 0, 1, 1], [], []>} : vector<64x32xbf16>, vector<32x32xbf16>, vector<64x32xf32> -> vector<64x32xf32>
    %8 = arith.index_cast %arg1 : i32 to index
    %c0_5 = arith.constant 0 : index
    %c0_6 = arith.constant 0 : index
    %9 = vector.load %arg6[%8, %c0_5, %c0_6] : memref<3x1x32xf32, #tpu.memory_space<vmem>>, vector<1x1x32xf32>
    %10 = vector.shape_cast %9 : vector<1x1x32xf32> to vector<1x32xf32>
    %11 = vector.broadcast %10 : vector<1x32xf32> to vector<64x32xf32>
    %12 = arith.addf %7, %11 : vector<64x32xf32>
    %cst_7 = arith.constant 5.000000e-01 : f32
    %13 = vector.broadcast %cst_7 : f32 to vector<64x32xf32>
    %14 = arith.mulf %13, %12 : vector<64x32xf32>
    %cst_8 = arith.constant 4.471500e-02 : f32
    %15 = vector.broadcast %cst_8 : f32 to vector<64x32xf32>
    %16 = arith.mulf %15, %12 : vector<64x32xf32>
    %17 = arith.mulf %16, %12 : vector<64x32xf32>
    %18 = arith.mulf %17, %12 : vector<64x32xf32>
    %19 = arith.addf %12, %18 : vector<64x32xf32>
    %cst_9 = arith.constant 0.797884583 : f32
    %20 = vector.broadcast %cst_9 : f32 to vector<64x32xf32>
    %21 = arith.mulf %20, %19 : vector<64x32xf32>
    %22 = math.tanh %21 : vector<64x32xf32>
    %cst_10 = arith.constant 1.000000e+00 : f32
    %23 = vector.broadcast %cst_10 : f32 to vector<64x32xf32>
    %24 = arith.addf %23, %22 : vector<64x32xf32>
    %25 = arith.mulf %14, %24 : vector<64x32xf32>
    %26 = vector.shape_cast %25 : vector<64x32xf32> to vector<8x8x32xf32>
    %c0_11 = arith.constant 0 : index
    %c0_12 = arith.constant 0 : index
    %27 = vector.load %arg4[%c0_11, %c0_12] : memref<8x8xf32, #tpu.memory_space<vmem>>, vector<8x8xf32>
    %28 = vector.extract_strided_slice %26 {offsets = [0, 0, 0], sizes = [8, 1, 32], strides = [1, 1, 1]} : vector<8x8x32xf32> to vector<8x1x32xf32>
    %29 = vector.shape_cast %28 : vector<8x1x32xf32> to vector<8x32xf32>
    %30 = vector.shape_cast %27 : vector<8x8xf32> to vector<8x8x1xf32>
    %31 = vector.broadcast %30 : vector<8x8x1xf32> to vector<8x8x32xf32>
    %32 = arith.mulf %26, %31 : vector<8x8x32xf32>
    %cst_13 = arith.constant dense<0.000000e+00> : vector<8x32xf32>
    %33 = vector.multi_reduction <add>, %32, %cst_13 [1] : vector<8x8x32xf32> to vector<8x32xf32>
    %cst_14 = arith.constant dense<0.000000e+00> : vector<8xf32>
    %34 = vector.multi_reduction <add>, %27, %cst_14 [1] : vector<8x8xf32> to vector<8xf32>
    %35 = vector.shape_cast %34 : vector<8xf32> to vector<8x1xf32>
    %cst_15 = arith.constant 1.000000e+00 : f32
    %36 = vector.broadcast %cst_15 : f32 to vector<8x1xf32>
    %37 = arith.maximumf %35, %36 : vector<8x1xf32>
    %38 = vector.broadcast %37 : vector<8x1xf32> to vector<8x32xf32>
    %39 = arith.divf %33, %38 : vector<8x32xf32>
    %40 = arith.truncf %29 : vector<8x32xf32> to vector<8x32xbf16>
    %41 = arith.index_cast %arg1 : i32 to index
    %c0_16 = arith.constant 0 : index
    %c0_17 = arith.constant 0 : index
    %42 = vector.load %arg7[%41, %c0_16, %c0_17] : memref<3x32x32xbf16, #tpu.memory_space<vmem>>, vector<1x32x32xbf16>
    %43 = vector.shape_cast %42 : vector<1x32x32xbf16> to vector<32x32xbf16>
    %cst_18 = arith.constant dense<0.000000e+00> : vector<8x32xf32>
    %44 = tpu.matmul %40, %43, %cst_18 {dimension_numbers = #tpu.dot_dimension_numbers<[1], [0], [0], [1], [0, 0, 1, 1], [], []>} : vector<8x32xbf16>, vector<32x32xbf16>, vector<8x32xf32> -> vector<8x32xf32>
    %45 = arith.index_cast %arg1 : i32 to index
    %c0_19 = arith.constant 0 : index
    %c0_20 = arith.constant 0 : index
    %46 = vector.load %arg8[%45, %c0_19, %c0_20] : memref<3x1x32xf32, #tpu.memory_space<vmem>>, vector<1x1x32xf32>
    %47 = vector.shape_cast %46 : vector<1x1x32xf32> to vector<1x32xf32>
    %48 = vector.broadcast %47 : vector<1x32xf32> to vector<8x32xf32>
    %49 = arith.addf %44, %48 : vector<8x32xf32>
    %50 = math.tanh %49 : vector<8x32xf32>
    %51 = arith.addf %39, %50 : vector<8x32xf32>
    %52 = arith.truncf %51 : vector<8x32xf32> to vector<8x32xbf16>
    %c0_21 = arith.constant 0 : index
    %c0_22 = arith.constant 0 : index
    %c0_23 = arith.constant 0 : index
    %53 = vector.load %arg9[%c0_21, %c0_22, %c0_23] : memref<1x32x640xbf16, #tpu.memory_space<vmem>>, vector<1x32x640xbf16>
    %54 = vector.shape_cast %53 : vector<1x32x640xbf16> to vector<32x640xbf16>
    %cst_24 = arith.constant dense<0.000000e+00> : vector<8x640xf32>
    %55 = tpu.matmul %52, %54, %cst_24 {dimension_numbers = #tpu.dot_dimension_numbers<[1], [0], [0], [1], [0, 0, 1, 1], [], []>} : vector<8x32xbf16>, vector<32x640xbf16>, vector<8x640xf32> -> vector<8x640xf32>
    %c0_i32_25 = arith.constant 0 : i32
    %56 = arith.cmpi eq, %arg1, %c0_i32_25 : i32
    %57 = arith.extui %56 : i1 to i32
    %c0_i32_26 = arith.constant 0 : i32
    %58 = arith.cmpi ne, %57, %c0_i32_26 : i32
    scf.if %58 {
      %cst_76 = arith.constant 0.000000e+00 : f32
      %214 = vector.broadcast %cst_76 : f32 to vector<8x640xf32>
      %c0_77 = arith.constant 0 : index
      %c0_78 = arith.constant 0 : index
      %215 = vector.load %arg10[%c0_77, %c0_78] : memref<8x640xf32, #tpu.memory_space<vmem>>, vector<8x640xf32>
      tpu.vector_store %arg10[%c0_77, %c0_78], %214 {strides = array<i32>} : memref<8x640xf32, #tpu.memory_space<vmem>>, vector<8x640xf32>,
      %cst_79 = arith.constant 0.000000e+00 : f32
      %216 = vector.broadcast %cst_79 : f32 to vector<8x128xf32>
      %c0_80 = arith.constant 0 : index
      %c0_81 = arith.constant 0 : index
      %217 = vector.load %arg13[%c0_80, %c0_81] : memref<8x128xf32, #tpu.memory_space<vmem>>, vector<8x128xf32>
      tpu.vector_store %arg13[%c0_80, %c0_81], %216 {strides = array<i32>} : memref<8x128xf32, #tpu.memory_space<vmem>>, vector<8x128xf32>,
    } else {
    }
    %59 = tpu.iota {dimensions = array<i32: 1>} : vector<1x128xi32>
    %c8_i32 = arith.constant 8 : i32
    %60 = vector.broadcast %c8_i32 : i32 to vector<1x128xi32>
    %61 = arith.cmpi slt, %59, %60 : vector<1x128xi32>
    %62 = tpu.iota {dimensions = array<i32: 1>} : vector<1x128xi32>
    %cst_27 = arith.constant 0.000000e+00 : f32
    %63 = vector.broadcast %cst_27 : f32 to vector<8x128xf32>
    %64 = vector.extract_strided_slice %55 {offsets = [0, 0], sizes = [8, 128], strides = [1, 1]} : vector<8x640xf32> to vector<8x128xf32>
    %cst_28 = arith.constant -1.000000e+30 : f32
    %65 = vector.shape_cast %61 : vector<1x128xi1> to vector<1x128xi1>
    %66 = vector.broadcast %65 : vector<1x128xi1> to vector<8x128xi1>
    %67 = vector.broadcast %cst_28 : f32 to vector<8x128xf32>
    %68 = arith.select %66, %64, %67 : vector<8x128xi1>, vector<8x128xf32>
    %cst_29 = arith.constant dense<0xFF800000> : vector<8xf32>
    %69 = vector.multi_reduction <maximumf>, %68, %cst_29 [1] : vector<8x128xf32> to vector<8xf32>
    %70 = vector.shape_cast %69 : vector<8xf32> to vector<8x1xf32>
    %71 = vector.broadcast %70 : vector<8x1xf32> to vector<8x128xf32>
    %72 = arith.subf %68, %71 : vector<8x128xf32>
    %73 = math.exp %72 : vector<8x128xf32>
    %cst_30 = arith.constant dense<0.000000e+00> : vector<8xf32>
    %74 = vector.multi_reduction <add>, %73, %cst_30 [1] : vector<8x128xf32> to vector<8xf32>
    %75 = vector.shape_cast %74 : vector<8xf32> to vector<8x1xf32>
    %76 = vector.broadcast %75 : vector<8x1xf32> to vector<8x128xf32>
    %77 = arith.divf %73, %76 : vector<8x128xf32>
    %c0_31 = arith.constant 0 : index
    %c0_32 = arith.constant 0 : index
    %78 = vector.load %arg10[%c0_31, %c0_32] : memref<8x640xf32, #tpu.memory_space<vmem>>, vector<8x128xf32>
    %79 = arith.addf %78, %77 : vector<8x128xf32>
    %c0_33 = arith.constant 0 : index
    %c0_34 = arith.constant 0 : index
    %80 = vector.load %arg10[%c0_33, %c0_34] : memref<8x640xf32, #tpu.memory_space<vmem>>, vector<8x128xf32>
    tpu.vector_store %arg10[%c0_33, %c0_34], %79 {strides = array<i32>} : memref<8x640xf32, #tpu.memory_space<vmem>>, vector<8x128xf32>,
    %cst_35 = arith.constant 9.99999993E-9 : f32
    %81 = vector.broadcast %cst_35 : f32 to vector<8x128xf32>
    %82 = arith.addf %77, %81 : vector<8x128xf32>
    %cst_36 = arith.constant 1.000000e+00 : f32
    %83 = vector.shape_cast %61 : vector<1x128xi1> to vector<1x128xi1>
    %84 = vector.broadcast %83 : vector<1x128xi1> to vector<8x128xi1>
    %85 = vector.broadcast %cst_36 : f32 to vector<8x128xf32>
    %86 = arith.select %84, %82, %85 : vector<8x128xi1>, vector<8x128xf32>
    %cst_37 = arith.constant 0.000000e+00 : f32
    %87 = vector.shape_cast %61 : vector<1x128xi1> to vector<1x128xi1>
    %88 = vector.broadcast %87 : vector<1x128xi1> to vector<8x128xi1>
    %89 = vector.broadcast %cst_37 : f32 to vector<8x128xf32>
    %90 = arith.select %88, %86, %89 : vector<8x128xi1>, vector<8x128xf32>
    %cst_38 = arith.constant dense<0.000000e+00> : vector<8xf32>
    %91 = vector.multi_reduction <add>, %90, %cst_38 [1] : vector<8x128xf32> to vector<8xf32>
    %92 = vector.shape_cast %91 : vector<8xf32> to vector<8x1xf32>
    %93 = math.log %86 : vector<8x128xf32>
    %94 = math.log %92 : vector<8x1xf32>
    %95 = vector.broadcast %94 : vector<8x1xf32> to vector<8x128xf32>
    %96 = arith.subf %93, %95 : vector<8x128xf32>
    %97 = tpu.reciprocal %92 {approx = true} : vector<8x1xf32> -> vector<8x1xf32>
    %98 = vector.broadcast %97 : vector<8x1xf32> to vector<8x128xf32>
    %99 = arith.mulf %86, %98 : vector<8x128xf32>
    %100 = arith.mulf %99, %96 : vector<8x128xf32>
    %cst_39 = arith.constant 0.000000e+00 : f32
    %101 = vector.shape_cast %61 : vector<1x128xi1> to vector<1x128xi1>
    %102 = vector.broadcast %101 : vector<1x128xi1> to vector<8x128xi1>
    %103 = vector.broadcast %cst_39 : f32 to vector<8x128xf32>
    %104 = arith.select %102, %100, %103 : vector<8x128xi1>, vector<8x128xf32>
    %cst_40 = arith.constant dense<0.000000e+00> : vector<8xf32>
    %105 = vector.multi_reduction <add>, %104, %cst_40 [1] : vector<8x128xf32> to vector<8xf32>
    %106 = vector.shape_cast %105 : vector<8xf32> to vector<8x1xf32>
    %cst_41 = arith.constant 0.000000e+00 : f32
    %107 = vector.broadcast %cst_41 : f32 to vector<8x1xf32>
    %108 = arith.subf %107, %106 : vector<8x1xf32>
    %c0_i32_42 = arith.constant 0 : i32
    %109 = vector.broadcast %c0_i32_42 : i32 to vector<1x128xi32>
    %110 = arith.cmpi eq, %62, %109 : vector<1x128xi32>
    %111 = arith.extui %110 : vector<1x128xi1> to vector<1x128xi32>
    %112 = arith.sitofp %111 : vector<1x128xi32> to vector<1x128xf32>
    %113 = vector.broadcast %108 : vector<8x1xf32> to vector<8x128xf32>
    %114 = vector.broadcast %112 : vector<1x128xf32> to vector<8x128xf32>
    %115 = arith.mulf %113, %114 : vector<8x128xf32>
    %116 = arith.addf %63, %115 : vector<8x128xf32>
    %117 = vector.extract_strided_slice %55 {offsets = [0, 128], sizes = [8, 128], strides = [1, 1]} : vector<8x640xf32> to vector<8x128xf32>
    %cst_43 = arith.constant -1.000000e+30 : f32
    %118 = vector.shape_cast %61 : vector<1x128xi1> to vector<1x128xi1>
    %119 = vector.broadcast %118 : vector<1x128xi1> to vector<8x128xi1>
    %120 = vector.broadcast %cst_43 : f32 to vector<8x128xf32>
    %121 = arith.select %119, %117, %120 : vector<8x128xi1>, vector<8x128xf32>
    %cst_44 = arith.constant dense<0xFF800000> : vector<8xf32>
    %122 = vector.multi_reduction <maximumf>, %121, %cst_44 [1] : vector<8x128xf32> to vector<8xf32>
    %123 = vector.shape_cast %122 : vector<8xf32> to vector<8x1xf32>
    %124 = vector.broadcast %123 : vector<8x1xf32> to vector<8x128xf32>
    %125 = arith.subf %121, %124 : vector<8x128xf32>
    %126 = math.exp %125 : vector<8x128xf32>
    %cst_45 = arith.constant dense<0.000000e+00> : vector<8xf32>
    %127 = vector.multi_reduction <add>, %126, %cst_45 [1] : vector<8x128xf32> to vector<8xf32>
    %128 = vector.shape_cast %127 : vector<8xf32> to vector<8x1xf32>
    %129 = vector.broadcast %128 : vector<8x1xf32> to vector<8x128xf32>
    %130 = arith.divf %126, %129 : vector<8x128xf32>
    %c0_46 = arith.constant 0 : index
    %c128 = arith.constant 128 : index
    %131 = vector.load %arg10[%c0_46, %c128] : memref<8x640xf32, #tpu.memory_space<vmem>>, vector<8x128xf32>
    %132 = arith.addf %131, %130 : vector<8x128xf32>
    %c0_47 = arith.constant 0 : index
    %c128_48 = arith.constant 128 : index
    %133 = vector.load %arg10[%c0_47, %c128_48] : memref<8x640xf32, #tpu.memory_space<vmem>>, vector<8x128xf32>
    tpu.vector_store %arg10[%c0_47, %c128_48], %132 {strides = array<i32>} : memref<8x640xf32, #tpu.memory_space<vmem>>, vector<8x128xf32>,
    %cst_49 = arith.constant 9.99999993E-9 : f32
    %134 = vector.broadcast %cst_49 : f32 to vector<8x128xf32>
    %135 = arith.addf %130, %134 : vector<8x128xf32>
    %cst_50 = arith.constant 1.000000e+00 : f32
    %136 = vector.shape_cast %61 : vector<1x128xi1> to vector<1x128xi1>
    %137 = vector.broadcast %136 : vector<1x128xi1> to vector<8x128xi1>
    %138 = vector.broadcast %cst_50 : f32 to vector<8x128xf32>
    %139 = arith.select %137, %135, %138 : vector<8x128xi1>, vector<8x128xf32>
    %cst_51 = arith.constant 0.000000e+00 : f32
    %140 = vector.shape_cast %61 : vector<1x128xi1> to vector<1x128xi1>
    %141 = vector.broadcast %140 : vector<1x128xi1> to vector<8x128xi1>
    %142 = vector.broadcast %cst_51 : f32 to vector<8x128xf32>
    %143 = arith.select %141, %139, %142 : vector<8x128xi1>, vector<8x128xf32>
    %cst_52 = arith.constant dense<0.000000e+00> : vector<8xf32>
    %144 = vector.multi_reduction <add>, %143, %cst_52 [1] : vector<8x128xf32> to vector<8xf32>
    %145 = vector.shape_cast %144 : vector<8xf32> to vector<8x1xf32>
    %146 = math.log %139 : vector<8x128xf32>
    %147 = math.log %145 : vector<8x1xf32>
    %148 = vector.broadcast %147 : vector<8x1xf32> to vector<8x128xf32>
    %149 = arith.subf %146, %148 : vector<8x128xf32>
    %150 = tpu.reciprocal %145 {approx = true} : vector<8x1xf32> -> vector<8x1xf32>
    %151 = vector.broadcast %150 : vector<8x1xf32> to vector<8x128xf32>
    %152 = arith.mulf %139, %151 : vector<8x128xf32>
    %153 = arith.mulf %152, %149 : vector<8x128xf32>
    %cst_53 = arith.constant 0.000000e+00 : f32
    %154 = vector.shape_cast %61 : vector<1x128xi1> to vector<1x128xi1>
    %155 = vector.broadcast %154 : vector<1x128xi1> to vector<8x128xi1>
    %156 = vector.broadcast %cst_53 : f32 to vector<8x128xf32>
    %157 = arith.select %155, %153, %156 : vector<8x128xi1>, vector<8x128xf32>
    %cst_54 = arith.constant dense<0.000000e+00> : vector<8xf32>
    %158 = vector.multi_reduction <add>, %157, %cst_54 [1] : vector<8x128xf32> to vector<8xf32>
    %159 = vector.shape_cast %158 : vector<8xf32> to vector<8x1xf32>
    %cst_55 = arith.constant 0.000000e+00 : f32
    %160 = vector.broadcast %cst_55 : f32 to vector<8x1xf32>
    %161 = arith.subf %160, %159 : vector<8x1xf32>
    %c1_i32_56 = arith.constant 1 : i32
    %162 = vector.broadcast %c1_i32_56 : i32 to vector<1x128xi32>
    %163 = arith.cmpi eq, %62, %162 : vector<1x128xi32>
    %164 = arith.extui %163 : vector<1x128xi1> to vector<1x128xi32>
    %165 = arith.sitofp %164 : vector<1x128xi32> to vector<1x128xf32>
    %166 = vector.broadcast %161 : vector<8x1xf32> to vector<8x128xf32>
    %167 = vector.broadcast %165 : vector<1x128xf32> to vector<8x128xf32>
    %168 = arith.mulf %166, %167 : vector<8x128xf32>
    %169 = arith.addf %116, %168 : vector<8x128xf32>
    %c0_57 = arith.constant 0 : index
    %c0_58 = arith.constant 0 : index
    %170 = vector.load %arg13[%c0_57, %c0_58] : memref<8x128xf32, #tpu.memory_space<vmem>>, vector<8x128xf32>
    %171 = arith.addf %170, %169 : vector<8x128xf32>
    %c0_59 = arith.constant 0 : index
    %c0_60 = arith.constant 0 : index
    %172 = vector.load %arg13[%c0_59, %c0_60] : memref<8x128xf32, #tpu.memory_space<vmem>>, vector<8x128xf32>
    tpu.vector_store %arg13[%c0_59, %c0_60], %171 {strides = array<i32>} : memref<8x128xf32, #tpu.memory_space<vmem>>, vector<8x128xf32>,
    %173 = vector.extract_strided_slice %55 {offsets = [0, 256], sizes = [8, 128], strides = [1, 1]} : vector<8x640xf32> to vector<8x128xf32>
    %174 = arith.negf %173 : vector<8x128xf32>
    %175 = math.exp %174 : vector<8x128xf32>
    %cst_61 = arith.constant 1.000000e+00 : f32
    %176 = vector.broadcast %cst_61 : f32 to vector<8x128xf32>
    %177 = arith.addf %176, %175 : vector<8x128xf32>
    %178 = arith.divf %176, %177 : vector<8x128xf32>
    %179 = vector.extract_strided_slice %55 {offsets = [0, 384], sizes = [8, 128], strides = [1, 1]} : vector<8x640xf32> to vector<8x128xf32>
    %180 = arith.negf %179 : vector<8x128xf32>
    %181 = math.exp %180 : vector<8x128xf32>
    %cst_62 = arith.constant 1.000000e+00 : f32
    %182 = vector.broadcast %cst_62 : f32 to vector<8x128xf32>
    %183 = arith.addf %182, %181 : vector<8x128xf32>
    %184 = arith.divf %182, %183 : vector<8x128xf32>
    %185 = tpu.iota {dimensions = array<i32: 1>} : vector<1x128xi32>
    %c3_i32 = arith.constant 3 : i32
    %186 = vector.broadcast %c3_i32 : i32 to vector<1x128xi32>
    %187 = arith.cmpi slt, %185, %186 : vector<1x128xi32>
    %188 = vector.extract_strided_slice %55 {offsets = [0, 512], sizes = [8, 128], strides = [1, 1]} : vector<8x640xf32> to vector<8x128xf32>
    %cst_63 = arith.constant -1.000000e+30 : f32
    %189 = vector.shape_cast %187 : vector<1x128xi1> to vector<1x128xi1>
    %190 = vector.broadcast %189 : vector<1x128xi1> to vector<8x128xi1>
    %191 = vector.broadcast %cst_63 : f32 to vector<8x128xf32>
    %192 = arith.select %190, %188, %191 : vector<8x128xi1>, vector<8x128xf32>
    %cst_64 = arith.constant dense<0xFF800000> : vector<8xf32>
    %193 = vector.multi_reduction <maximumf>, %192, %cst_64 [1] : vector<8x128xf32> to vector<8xf32>
    %194 = vector.shape_cast %193 : vector<8xf32> to vector<8x1xf32>
    %195 = vector.broadcast %194 : vector<8x1xf32> to vector<8x128xf32>
    %196 = arith.subf %192, %195 : vector<8x128xf32>
    %197 = math.exp %196 : vector<8x128xf32>
    %cst_65 = arith.constant dense<0.000000e+00> : vector<8xf32>
    %198 = vector.multi_reduction <add>, %197, %cst_65 [1] : vector<8x128xf32> to vector<8xf32>
    %199 = vector.shape_cast %198 : vector<8xf32> to vector<8x1xf32>
    %200 = vector.broadcast %199 : vector<8x1xf32> to vector<8x128xf32>
    %201 = arith.divf %197, %200 : vector<8x128xf32>
    %c0_66 = arith.constant 0 : index
    %c256 = arith.constant 256 : index
    %202 = vector.load %arg10[%c0_66, %c256] : memref<8x640xf32, #tpu.memory_space<vmem>>, vector<8x128xf32>
    %203 = arith.addf %202, %178 : vector<8x128xf32>
    %c0_67 = arith.constant 0 : index
    %c256_68 = arith.constant 256 : index
    %204 = vector.load %arg10[%c0_67, %c256_68] : memref<8x640xf32, #tpu.memory_space<vmem>>, vector<8x128xf32>
    tpu.vector_store %arg10[%c0_67, %c256_68], %203 {strides = array<i32>} : memref<8x640xf32, #tpu.memory_space<vmem>>, vector<8x128xf32>,
    %c0_69 = arith.constant 0 : index
    %c384 = arith.constant 384 : index
    %205 = vector.load %arg10[%c0_69, %c384] : memref<8x640xf32, #tpu.memory_space<vmem>>, vector<8x128xf32>
    %206 = arith.addf %205, %184 : vector<8x128xf32>
    %c0_70 = arith.constant 0 : index
    %c384_71 = arith.constant 384 : index
    %207 = vector.load %arg10[%c0_70, %c384_71] : memref<8x640xf32, #tpu.memory_space<vmem>>, vector<8x128xf32>
    tpu.vector_store %arg10[%c0_70, %c384_71], %206 {strides = array<i32>} : memref<8x640xf32, #tpu.memory_space<vmem>>, vector<8x128xf32>,
    %c0_72 = arith.constant 0 : index
    %c512 = arith.constant 512 : index
    %208 = vector.load %arg10[%c0_72, %c512] : memref<8x640xf32, #tpu.memory_space<vmem>>, vector<8x128xf32>
    %209 = arith.addf %208, %201 : vector<8x128xf32>
    %c0_73 = arith.constant 0 : index
    %c512_74 = arith.constant 512 : index
    %210 = vector.load %arg10[%c0_73, %c512_74] : memref<8x640xf32, #tpu.memory_space<vmem>>, vector<8x128xf32>
    tpu.vector_store %arg10[%c0_73, %c512_74], %209 {strides = array<i32>} : memref<8x640xf32, #tpu.memory_space<vmem>>, vector<8x128xf32>,
    %c2_i32 = arith.constant 2 : i32
    %211 = arith.cmpi eq, %arg1, %c2_i32 : i32
    %212 = arith.extui %211 : i1 to i32
    %c0_i32_75 = arith.constant 0 : i32
    %213 = arith.cmpi ne, %212, %c0_i32_75 : i32
    scf.if %213 {
      %c0_76 = arith.constant 0 : index
      %c0_77 = arith.constant 0 : index
      %214 = vector.load %arg10[%c0_76, %c0_77] : memref<8x640xf32, #tpu.memory_space<vmem>>, vector<8x640xf32>
      %cst_78 = arith.constant 0.333333343 : f32
      %215 = vector.broadcast %cst_78 : f32 to vector<8x640xf32>
      %216 = arith.mulf %214, %215 : vector<8x640xf32>
      %c0_79 = arith.constant 0 : index
      %c0_80 = arith.constant 0 : index
      %217 = vector.load %arg10[%c0_79, %c0_80] : memref<8x640xf32, #tpu.memory_space<vmem>>, vector<8x640xf32>
      tpu.vector_store %arg10[%c0_79, %c0_80], %216 {strides = array<i32>} : memref<8x640xf32, #tpu.memory_space<vmem>>, vector<8x640xf32>,
      %cst_81 = arith.constant 0.000000e+00 : f32
      %218 = vector.broadcast %cst_81 : f32 to vector<8x128xf32>
      %219 = vector.extract_strided_slice %216 {offsets = [0, 0], sizes = [8, 128], strides = [1, 1]} : vector<8x640xf32> to vector<8x128xf32>
      %cst_82 = arith.constant 9.99999993E-9 : f32
      %220 = vector.broadcast %cst_82 : f32 to vector<8x128xf32>
      %221 = arith.addf %219, %220 : vector<8x128xf32>
      %cst_83 = arith.constant 1.000000e+00 : f32
      %222 = vector.shape_cast %61 : vector<1x128xi1> to vector<1x128xi1>
      %223 = vector.broadcast %222 : vector<1x128xi1> to vector<8x128xi1>
      %224 = vector.broadcast %cst_83 : f32 to vector<8x128xf32>
      %225 = arith.select %223, %221, %224 : vector<8x128xi1>, vector<8x128xf32>
      %cst_84 = arith.constant 0.000000e+00 : f32
      %226 = vector.shape_cast %61 : vector<1x128xi1> to vector<1x128xi1>
      %227 = vector.broadcast %226 : vector<1x128xi1> to vector<8x128xi1>
      %228 = vector.broadcast %cst_84 : f32 to vector<8x128xf32>
      %229 = arith.select %227, %225, %228 : vector<8x128xi1>, vector<8x128xf32>
      %cst_85 = arith.constant dense<0.000000e+00> : vector<8xf32>
      %230 = vector.multi_reduction <add>, %229, %cst_85 [1] : vector<8x128xf32> to vector<8xf32>
      %231 = vector.shape_cast %230 : vector<8xf32> to vector<8x1xf32>
      %232 = math.log %225 : vector<8x128xf32>
      %233 = math.log %231 : vector<8x1xf32>
      %234 = vector.broadcast %233 : vector<8x1xf32> to vector<8x128xf32>
      %235 = arith.subf %232, %234 : vector<8x128xf32>
      %236 = tpu.reciprocal %231 {approx = true} : vector<8x1xf32> -> vector<8x1xf32>
      %237 = vector.broadcast %236 : vector<8x1xf32> to vector<8x128xf32>
      %238 = arith.mulf %225, %237 : vector<8x128xf32>
      %239 = arith.mulf %238, %235 : vector<8x128xf32>
      %cst_86 = arith.constant 0.000000e+00 : f32
      %240 = vector.shape_cast %61 : vector<1x128xi1> to vector<1x128xi1>
      %241 = vector.broadcast %240 : vector<1x128xi1> to vector<8x128xi1>
      %242 = vector.broadcast %cst_86 : f32 to vector<8x128xf32>
      %243 = arith.select %241, %239, %242 : vector<8x128xi1>, vector<8x128xf32>
      %cst_87 = arith.constant dense<0.000000e+00> : vector<8xf32>
      %244 = vector.multi_reduction <add>, %243, %cst_87 [1] : vector<8x128xf32> to vector<8xf32>
      %245 = vector.shape_cast %244 : vector<8xf32> to vector<8x1xf32>
      %cst_88 = arith.constant 0.000000e+00 : f32
      %246 = vector.broadcast %cst_88 : f32 to vector<8x1xf32>
      %247 = arith.subf %246, %245 : vector<8x1xf32>
      %c0_i32_89 = arith.constant 0 : i32
      %248 = vector.broadcast %c0_i32_89 : i32 to vector<1x128xi32>
      %249 = arith.cmpi eq, %62, %248 : vector<1x128xi32>
      %250 = arith.extui %249 : vector<1x128xi1> to vector<1x128xi32>
      %251 = arith.sitofp %250 : vector<1x128xi32> to vector<1x128xf32>
      %252 = vector.broadcast %247 : vector<8x1xf32> to vector<8x128xf32>
      %253 = vector.broadcast %251 : vector<1x128xf32> to vector<8x128xf32>
      %254 = arith.mulf %252, %253 : vector<8x128xf32>
      %255 = arith.addf %218, %254 : vector<8x128xf32>
      %256 = vector.extract_strided_slice %216 {offsets = [0, 128], sizes = [8, 128], strides = [1, 1]} : vector<8x640xf32> to vector<8x128xf32>
      %cst_90 = arith.constant 9.99999993E-9 : f32
      %257 = vector.broadcast %cst_90 : f32 to vector<8x128xf32>
      %258 = arith.addf %256, %257 : vector<8x128xf32>
      %cst_91 = arith.constant 1.000000e+00 : f32
      %259 = vector.shape_cast %61 : vector<1x128xi1> to vector<1x128xi1>
      %260 = vector.broadcast %259 : vector<1x128xi1> to vector<8x128xi1>
      %261 = vector.broadcast %cst_91 : f32 to vector<8x128xf32>
      %262 = arith.select %260, %258, %261 : vector<8x128xi1>, vector<8x128xf32>
      %cst_92 = arith.constant 0.000000e+00 : f32
      %263 = vector.shape_cast %61 : vector<1x128xi1> to vector<1x128xi1>
      %264 = vector.broadcast %263 : vector<1x128xi1> to vector<8x128xi1>
      %265 = vector.broadcast %cst_92 : f32 to vector<8x128xf32>
      %266 = arith.select %264, %262, %265 : vector<8x128xi1>, vector<8x128xf32>
      %cst_93 = arith.constant dense<0.000000e+00> : vector<8xf32>
      %267 = vector.multi_reduction <add>, %266, %cst_93 [1] : vector<8x128xf32> to vector<8xf32>
      %268 = vector.shape_cast %267 : vector<8xf32> to vector<8x1xf32>
      %269 = math.log %262 : vector<8x128xf32>
      %270 = math.log %268 : vector<8x1xf32>
      %271 = vector.broadcast %270 : vector<8x1xf32> to vector<8x128xf32>
      %272 = arith.subf %269, %271 : vector<8x128xf32>
      %273 = tpu.reciprocal %268 {approx = true} : vector<8x1xf32> -> vector<8x1xf32>
      %274 = vector.broadcast %273 : vector<8x1xf32> to vector<8x128xf32>
      %275 = arith.mulf %262, %274 : vector<8x128xf32>
      %276 = arith.mulf %275, %272 : vector<8x128xf32>
      %cst_94 = arith.constant 0.000000e+00 : f32
      %277 = vector.shape_cast %61 : vector<1x128xi1> to vector<1x128xi1>
      %278 = vector.broadcast %277 : vector<1x128xi1> to vector<8x128xi1>
      %279 = vector.broadcast %cst_94 : f32 to vector<8x128xf32>
      %280 = arith.select %278, %276, %279 : vector<8x128xi1>, vector<8x128xf32>
      %cst_95 = arith.constant dense<0.000000e+00> : vector<8xf32>
      %281 = vector.multi_reduction <add>, %280, %cst_95 [1] : vector<8x128xf32> to vector<8xf32>
      %282 = vector.shape_cast %281 : vector<8xf32> to vector<8x1xf32>
      %cst_96 = arith.constant 0.000000e+00 : f32
      %283 = vector.broadcast %cst_96 : f32 to vector<8x1xf32>
      %284 = arith.subf %283, %282 : vector<8x1xf32>
      %c1_i32_97 = arith.constant 1 : i32
      %285 = vector.broadcast %c1_i32_97 : i32 to vector<1x128xi32>
      %286 = arith.cmpi eq, %62, %285 : vector<1x128xi32>
      %287 = arith.extui %286 : vector<1x128xi1> to vector<1x128xi32>
      %288 = arith.sitofp %287 : vector<1x128xi32> to vector<1x128xf32>
      %289 = vector.broadcast %284 : vector<8x1xf32> to vector<8x128xf32>
      %290 = vector.broadcast %288 : vector<1x128xf32> to vector<8x128xf32>
      %291 = arith.mulf %289, %290 : vector<8x128xf32>
      %292 = arith.addf %255, %291 : vector<8x128xf32>
      %c0_98 = arith.constant 0 : index
      %c0_99 = arith.constant 0 : index
      %293 = vector.load %arg13[%c0_98, %c0_99] : memref<8x128xf32, #tpu.memory_space<vmem>>, vector<8x128xf32>
      %cst_100 = arith.constant 0.333333343 : f32
      %294 = vector.broadcast %cst_100 : f32 to vector<8x128xf32>
      %295 = arith.mulf %293, %294 : vector<8x128xf32>
      %296 = arith.subf %292, %295 : vector<8x128xf32>
      %c0_101 = arith.constant 0 : index
      %c0_102 = arith.constant 0 : index
      %297 = vector.load %arg11[%c0_101, %c0_102] : memref<8x128xf32, #tpu.memory_space<vmem>>, vector<8x128xf32>
      tpu.vector_store %arg11[%c0_101, %c0_102], %296 {strides = array<i32>} : memref<8x128xf32, #tpu.memory_space<vmem>>, vector<8x128xf32>,
    } else {
    }
    return
  }
  func.func @transform_0(%arg0: i32, %arg1: i32, %arg2: memref<64xi32, #tpu.memory_space<smem>>) -> (i32, i32) {
    %c0_i32 = arith.constant 0 : i32
    %c0_i32_0 = arith.constant 0 : i32
    %c0_i32_1 = arith.constant 0 : i32
    return %c0_i32, %c0_i32_0 : i32, i32
  }
  func.func @transform_1(%arg0: i32, %arg1: i32, %arg2: memref<64xi32, #tpu.memory_space<smem>>) -> (i32, i32) {
    %c0_i32 = arith.constant 0 : i32
    %c0_i32_0 = arith.constant 0 : i32
    return %arg0, %c0_i32 : i32, i32
  }
  func.func @transform_2(%arg0: i32, %arg1: i32, %arg2: memref<64xi32, #tpu.memory_space<smem>>) -> (i32, i32, i32) {
    %c0_i32 = arith.constant 0 : i32
    %c0_i32_0 = arith.constant 0 : i32
    %c0_i32_1 = arith.constant 0 : i32
    %c0_i32_2 = arith.constant 0 : i32
    return %c0_i32, %c0_i32_0, %c0_i32_1 : i32, i32, i32
  }
  func.func @transform_3(%arg0: i32, %arg1: i32, %arg2: memref<64xi32, #tpu.memory_space<smem>>) -> (i32, i32, i32) {
    %c0_i32 = arith.constant 0 : i32
    %c0_i32_0 = arith.constant 0 : i32
    %c0_i32_1 = arith.constant 0 : i32
    %c0_i32_2 = arith.constant 0 : i32
    return %c0_i32, %c0_i32_0, %c0_i32_1 : i32, i32, i32
  }
  func.func @transform_4(%arg0: i32, %arg1: i32, %arg2: memref<64xi32, #tpu.memory_space<smem>>) -> (i32, i32, i32) {
    %c0_i32 = arith.constant 0 : i32
    %c0_i32_0 = arith.constant 0 : i32
    %c0_i32_1 = arith.constant 0 : i32
    %c0_i32_2 = arith.constant 0 : i32
    return %c0_i32, %c0_i32_0, %c0_i32_1 : i32, i32, i32
  }
  func.func @transform_5(%arg0: i32, %arg1: i32, %arg2: memref<64xi32, #tpu.memory_space<smem>>) -> (i32, i32, i32) {
    %c0_i32 = arith.constant 0 : i32
    %c0_i32_0 = arith.constant 0 : i32
    %c0_i32_1 = arith.constant 0 : i32
    %c0_i32_2 = arith.constant 0 : i32
    return %c0_i32, %c0_i32_0, %c0_i32_1 : i32, i32, i32
  }
  func.func @transform_6(%arg0: i32, %arg1: i32, %arg2: memref<64xi32, #tpu.memory_space<smem>>) -> (i32, i32, i32) {
    %c0_i32 = arith.constant 0 : i32
    %c0_i32_0 = arith.constant 0 : i32
    %c0_i32_1 = arith.constant 0 : i32
    return %arg1, %c0_i32, %c0_i32_0 : i32, i32, i32
  }
  func.func @transform_7(%arg0: i32, %arg1: i32, %arg2: memref<64xi32, #tpu.memory_space<smem>>) -> (i32, i32) {
    %c0_i32 = arith.constant 0 : i32
    %c0_i32_0 = arith.constant 0 : i32
    return %arg0, %c0_i32 : i32, i32
  }
  func.func @transform_8(%arg0: i32, %arg1: i32, %arg2: memref<64xi32, #tpu.memory_space<smem>>) -> (i32, i32) {
    %c0_i32 = arith.constant 0 : i32
    %c0_i32_0 = arith.constant 0 : i32
    return %arg0, %c0_i32 : i32, i32
  }
}

</mosaic_0001>

<bundles_post_ra>
// kernel: tpu_custom_call.1
= control target key start
LH: loop header
LB: loop body
LE: loop exit
PB: predicated region body
PF: predicated region fallthrough
CT: control target
= control target key end

     0   :  { %s1917_s12 = smov [#allocation5]   ;;  %s2575_s0 = inlined_call_operand.vmem [shape: s32[64], index: 0, kind: input, shape index: {}]   ;;  %s2576_s1 = inlined_call_operand.vmem [shape: f32[192,32], index: 1, kind: input, shape index: {}]   ;;  %s2577_s2 = inlined_call_operand.vmem [shape: f32[8,8], index: 2, kind: input, shape index: {}]   ;;  %s2578_s3 = inlined_call_operand.hbm [shape: bf16[3,32,32], index: 3, kind: input, shape index: {}]   ;;  %s2579_s4 = inlined_call_operand.vmem [shape: f32[3,1,32], index: 4, kind: input, shape index: {}]   ;;  %s2580_s5 = inlined_call_operand.hbm [shape: bf16[3,32,32], index: 5, kind: input, shape index: {}]   ;;  %s2581_s6 = inlined_call_operand.vmem [shape: f32[3,1,32], index: 6, kind: input, shape index: {}]   ;;  %s2582_s7 = inlined_call_operand.vmem [shape: bf16[3,32,640], index: 7, kind: input, shape index: {}]   ;;  %s2583_s8 = inlined_call_operand.hbm [shape: f32[8,640], index: 8, kind: output, shape index: {0}]   ;;  %s2584_s9 = inlined_call_operand.hbm [shape: f32[8,128], index: 9, kind: output, shape index: {1}]  }
   0x1   :  { %s16_s11 = sshll.u32 %s2575_s0, 4  ;;  %s17_s11 = int_to_ptr.vmem [resolvable:$true] %s16_s11 }
   0x2   :  { %19 = dma.vmem_to_smem %s17_s11, 16, %s1917_s12, [#allocation4] }
   0x3   :  { %1883 = dma.done.wait [#allocation4], 16 }
   0x4   :  { %1884 = vsyncadd [#allocation4], 4294967280 }
   0x5   :  { %22 = sfence }
   0x6   :  { %23 = vsyncpa [#allocation7], 0 }
   0x7   :  { %24 = vsyncpa [#allocation10], 0 }
   0x8   :  { %25 = vsyncpa [#allocation8], 0 }
   0x9   :  { %26 = vsyncpa [#allocation13], 0  ;;  %s1979_s13 = smov 0   ;;  %s1981_s14 = smov 0  }
   0xa   :  { %s1983_s15 = smov 0  }
   0xb LB: > { %s1473_s0 = sadd.s32 4294967295, %s1911_s15   ;;  %s41_s16 = sadd.s32 1, %s1907_s14  ;;  %s1911_s15 = sphi %s1983_s15, %s32_s15   ;;  %s1907_s14 = sphi %s1981_s14, %s2633_s14   ;;  %s1903_s13 = sphi %s1979_s13, %s2632_s13  }
   0xc   : > { %p42_p0 = scmp.ge.s32.totalorder %s41_s16, 3  ;;  %p1474_p1 = scmp.ge.s32.totalorder %s1911_s15, 1 }
   0xd   : > { %p258_p2 = scmp.lt.s32.totalorder %s1911_s15, 4  ;;  %p2006_p4 = scmp.eq.s32.totalorder %s1473_s0, 0 }
   0xe   : > { %s2635_s16 = smov (%p42_p0, %s41_s16), 0  ;;  %s279_s21 = sshll.u32 %s2578_s3, 4  ;;  %s280_s21 = int_to_ptr.hbm [resolvable:$true] %s279_s21 }
   0xf   : > { %p2000_p3 = pnand %p1474_p1, %p258_p2  ;;  %s1918_s22 = smov [#allocation6]  }
  0x10   : > { %s281_s23 = sshll.u32 %s1918_s22, 4  ;;  %s296_s26 = sshll.u32 %s2580_s5, 4  ;;  %s282_s23 = int_to_ptr.vmem [resolvable:$true] %s281_s23  ;;  %s297_s26 = int_to_ptr.hbm [resolvable:$true] %s296_s26 }
  0x11   : > { %p1600_p5 = pneg %p2000_p3  ;;  %s1919_s27 = smov 64  }
  0x12   : > { %s1920_s28 = smov 4   ;;  %s1921_s29 = smov [#allocation9]  }
  0x13   : > { %p1601_p6 = pnand %p2006_p4, %p1600_p5  ;;  %s298_s30 = sshll.u32 %s1921_s29, 4  ;;  %s299_s30 = int_to_ptr.vmem [resolvable:$true] %s298_s30 }
  0x14   : > { %325 = sbr.rel (%p2000_p3) target bundleno = 1382 (0x566), region = 48 }
  0x15   : > { %1603 = dma.hbm_to_vmem [thread:$0]  (!%p1601_p6), %s280_s21, 768, %s282_s23, [#allocation7], %s1919_s27, %s1919_s27, %s1920_s28  }
  0x16   : > { %1606 = dma.hbm_to_vmem [thread:$0]  (!%p1601_p6), %s297_s26, 768, %s299_s30, [#allocation10], %s1919_s27, %s1919_s27, %s1920_s28  }
  0x19   : > { %1886 = dma.done.wait (%p2006_p4), [#allocation7], 768  }
  0x1a   : > { %1888 = vsyncadd (%p2006_p4), [#allocation7], 4294966528 }
  0x1b   : > { %1890 = dma.done.wait (%p2006_p4), [#allocation10], 768  }
  0x1c   : > { %1892 = vsyncadd (%p2006_p4), [#allocation10], 4294966528  ;;  %p368_p7 = scmp.lt.s32.totalorder %s1903_s13, 2  ;;  %s1913_s20 = smov 0  }
  0x1e   : > { %s369_s10 = scalar_select %p368_p7, %s1903_s13, 2 }
  0x20   : > { %s1583_s11 = smul.u32 80, %s369_s10 }
  0x22   : > { %s2035_s19 = scalar_lea.vmem %s2582_s7, %s1583_s11 }
  0x23 LB: >> { %s382_s21 = sld [smem:[#allocation5 + %s1915_s20]]  ;;  %s1483_s22 = sshll.u32 %s1903_s13, 6  ;;  %vm388_vm0 = vcmask 253952   ;;  %s1915_s20 = sphi %s1913_s20, %s380_s20  }
  0x24   : >> { %s387_s26 = scalar_lea.vmem [#allocation2], %s1915_s20  ;;  %s380_s20 = sadd.s32 1, %s1915_s20  }
  0x25   : >> { %p377_p8 = scmp.ge.s32.totalorder %s380_s20, 64  }
  0x26   : > { %s1565_s27 = sshll.u32 (%p377_p8), %s1903_s13, 4  ;;  %v542_v1 = vlaneseq (%p377_p8)  ;;  %vm661_vm1 = vcmask (%p377_p8), 64512   ;;  %v540_v4 = vld [vmem:[%s2577_s2] sm:$0xff] (%p377_p8)  ;;  %s409_s12 = scalar_lea.vmem (%p377_p8), %s2579_s4, %s1903_s13  ;;  %vm2585_vm2 = vcmask (%p377_p8), 261120   ;;  %vm838_vm3 = vcmask (%p377_p8), 1041409  }
  0x27   : > { %s404_s28 = scalar_lea.vmem (%p377_p8), [#allocation6], %s1565_s27  ;;  %v662_v8 = vsel (%p377_p8), %vm661_vm1, %v540_v4, 0.0  ;;  %v555_v13 = vperm.slane (%p377_p8), %v540_v4, 2  ;;  %v562_v14 = vperm.slane (%p377_p8), %v540_v4, 3  ;;  %v541_v15 = vperm.slane (%p377_p8), %v540_v4, 0  ;;  %s811_s18 = scalar_lea.vmem (%p377_p8), [#allocation9], %s1565_s27 }
  0x28   : > { %379 = sbr.rel (!%p377_p8) target bundleno = 35 (0x23), region = 118  ;;  %v1567_v2 = vld [vmem:[%s404_s28 + $0x8] sm:$0xff] (%p377_p8)  ;;  %v543_v3 = vshrl.u32 (%p377_p8), %v542_v1, 7  ;;  %v1566_v9 = vld [vmem:[%s404_s28] sm:$0xff] (%p377_p8)  ;;  %663 = vadd.xlane.f32.xlu0 (%p377_p8), %v662_v8  ;;  %v569_v16 = vperm.slane (%p377_p8), %v540_v4, 4  ;;  %v548_v19 = vperm.slane (%p377_p8), %v540_v4, 1 }
  0x29   : >> { %s384_s23 = sadd.s32 %s1483_s22, %s382_s21  ;;  %445 = vmatpush.bf16.msra.mxu0 (%p377_p8), %v1567_v2  ;;  %1581 = vmatpush.bf16.msra.mxu1 (%p377_p8), %v1567_v2  ;;  %v576_v21 = vperm.slane (%p377_p8), %v540_v4, 5  ;;  %v583_v22 = vperm.slane (%p377_p8), %v540_v4, 6  ;;  %v590_v23 = vperm.slane (%p377_p8), %v540_v4, 7  ;;  %s816_s21 = scalar_lea.vmem (%p377_p8), %s2581_s6, %s1903_s13  ;;  %v1659_v30 = vld [vmem:[%s409_s12] ss:$0 sm:$0xff] (%p377_p8)  ;;  %vm841_vm4 = vcmask (%p377_p8), 1042434  }
  0x2a   : >> { %s385_s25 = scalar_lea.vmem %s2576_s1, %s384_s23  ;;  %1657 = vset.pattern.permute.xlu1 (%p377_p8), %v543_v3  ;;  %1656 = vset.pattern.permute.xlu0 (%p377_p8), %v543_v3  ;;  %vm2590_vm5 = vcmask (%p377_p8), 1043459   ;;  %vm2589_vm6 = vcmask (%p377_p8), 1044484   ;;  %vm2588_vm7 = vcmask (%p377_p8), 1045509   ;;  %vm2587_vm8 = vcmask (%p377_p8), 1046534   ;;  %p1553_p9 = scmp.ne.s32.totalorder (%p377_p8), %s1903_s13, 0 }
  0x2b   : >> { %v386_v0 = vld [vmem:[%s385_s25] sm:$0x1]  ;;  %1658 = vset.pattern.permute.xlu2 (%p377_p8), %v543_v3  ;;  %vm2586_vm9 = vcmask (%p377_p8), 1047559  }
  0x2c   : >> { %389 = vst.msk [vmem:[%s387_s26] sm:$0x1] %vm388_vm0, %v386_v0 }
  0x2d   : > { %446 = vmatpush.bf16.msra.mxu0 %v1566_v9  ;;  %1582 = vmatpush.bf16.msra.mxu1 %v1566_v9 }
  0x32   : > { %560 = vperm.xlu1 %1657, %v555_v13  }
  0x33   : > { %v390_v5 = vld [vmem:[#allocation2] sm:$0xff]  ;;  %v391_v6 = vld [vmem:[#allocation2 + $0x8] sm:$0xff]  ;;  %v396_v7 = vld [vmem:[#allocation2 + $0x30] sm:$0xff]  ;;  %567 = vperm.xlu2 %1658, %v562_v14  }
  0x34   : > { %v397_v10 = vld [vmem:[#allocation2 + $0x38] sm:$0xff]  ;;  %v398_v11 = vpack.c.bf16 %v391_v6, %v390_v5  ;;  %v392_v17 = vld [vmem:[#allocation2 + $0x10] sm:$0xff]  ;;  %v394_v24 = vld [vmem:[#allocation2 + $0x20] sm:$0xff] }
  0x35   : > { %v401_v12 = vpack.c.bf16 %v397_v10, %v396_v7  ;;  %v393_v18 = vld [vmem:[#allocation2 + $0x18] sm:$0xff]  ;;  %v395_v25 = vld [vmem:[#allocation2 + $0x28] sm:$0xff] }
  0x36   : > { %1494 = vmatmul.msk.bf16.vlgmr.msra.gmra.mxu0 %vm2585_vm2, %v398_v11  ;;  %v399_v20 = vpack.c.bf16 %v393_v18, %v392_v17  ;;  %v400_v26 = vpack.c.bf16 %v395_v25, %v394_v24 }
  0x37   : > { %1497 = vmatmul.msk.bf16.vlgmr.msra.gmra.mxu1 %vm2585_vm2, %v401_v12 }
  0x3a   : > { %546 = vperm.xlu1 %1657, %v541_v15  }
  0x3b   : > { %574 = vperm.xlu2 %1658, %v569_v16  }
  0x3c   : > { %553 = vperm.xlu0 %1656, %v548_v19  }
  0x42   : > { %581 = vperm.xlu1 %1657, %v576_v21   ;;  %v1570_v21 = vld [vmem:[%s811_s18 + $0x8] sm:$0xff] }
  0x43   : > { %588 = vperm.xlu2 %1658, %v583_v22   ;;  %880 = vmatpush.bf16.msrb.mxu1 %v1570_v21 }
  0x46   : > { %1495 = vmatmul.msk.bf16.gmra.mxu0 %vm2585_vm2, %v399_v20 }
  0x4a   : > { %595 = vperm.xlu1 %1657, %v590_v23  }
  0x56   : > { %1496 = vmatmul.msk.bf16.gmra.mxu0 %vm2585_vm2, %v400_v26  ;;  %v1569_v26 = vld [vmem:[%s811_s18] sm:$0xff] }
  0x57   : > { %881 = vmatpush.bf16.msrb.mxu1 %v1569_v26 }
  0xa4   : > { %v561_v26 = vpop.permute.xlu1 %560 }
  0xb3   : > { %v448_v27 = vpop.f32.mrf.mxu0 }
  0xb4   : > { %v2072_v36 = vadd.f32 %v1659_v30, %v448_v27  ;;  %v463_v37 = vpop.f32.mrf.mxu1 }
  0xb5   : > { %v2078_v42 = vadd.f32 %v1659_v30, %v463_v37 }
  0xb6   : > { %v476_v41 = vmul.f32 0.044715, %v2072_v36 }
  0xb7   : > { %v482_v48 = vmul.f32 0.044715, %v2078_v42 }
  0xb8   : > { %v484_v50 = vmul.f32 %v476_v41, %v2072_v36 }
  0xb9   : > { %v490_v58 = vmul.f32 %v482_v48, %v2078_v42 }
  0xba   : > { %v492_v57 = vmul.f32 %v484_v50, %v2072_v36 }
  0xbb   : > { %v450_v28 = vpop.f32.mrf.mxu0  ;;  %v498_v3 = vmul.f32 %v490_v58, %v2078_v42 }
  0xbc   : > { %v2065_v31 = vadd.f32 %v1659_v30, %v450_v28  ;;  %v465_v53 = vpop.f32.mrf.mxu1  ;;  %v500_v2 = vadd.f32 %v492_v57, %v2072_v36 }
  0xbd   : > { %v2091_v59 = vadd.f32 %v1659_v30, %v465_v53  ;;  %v506_v9 = vadd.f32 %v498_v3, %v2078_v42 }
  0xbe   : > { %v477_v34 = vmul.f32 0.044715, %v2065_v31  ;;  %v508_v8 = vmul.f32 0.7978846, %v500_v2 }
  0xbf   : > { %v483_v4 = vmul.f32 0.044715, %v2091_v59  ;;  %v514_v13 = vmul.f32 0.7978846, %v506_v9 }
  0xc0   : > { %v485_v40 = vmul.f32 %v477_v34, %v2065_v31 }
  0xc1   : > { %v491_v10 = vmul.f32 %v483_v4, %v2091_v59 }
  0xc2   : > { %v493_v46 = vmul.f32 %v485_v40, %v2065_v31 }
  0xc3   : > { %v453_v29 = vpop.f32.mrf.mxu0  ;;  %v499_v12 = vmul.f32 %v491_v10, %v2091_v59 }
  0xc4   : > { %v2067_v32 = vadd.f32 %v1659_v30, %v453_v29  ;;  %v501_v54 = vadd.f32 %v493_v46, %v2065_v31  ;;  %v469_v29 = vmul.f32 0.5, %v2065_v31  ;;  %v468_v31 = vmul.f32 0.5, %v2072_v36 }
  0xc5   : > { %v507_v15 = vadd.f32 %v499_v12, %v2091_v59 }
  0xc6   : > { %v478_v38 = vmul.f32 0.044715, %v2067_v32  ;;  %v509_v62 = vmul.f32 0.7978846, %v501_v54 }
  0xc7   : > { %v515_v19 = vmul.f32 0.7978846, %v507_v15 }
  0xc8   : > { %v486_v43 = vmul.f32 %v478_v38, %v2067_v32  ;;  %1661 = vtanh.f32 %v509_v62 }
  0xca   : > { %v494_v49 = vmul.f32 %v486_v43, %v2067_v32 }
  0xcb   : > { %v455_v33 = vpop.f32.mrf.mxu0 }
  0xcc   : > { %v2070_v35 = vadd.f32 %v1659_v30, %v455_v33  ;;  %v502_v56 = vadd.f32 %v494_v49, %v2067_v32 }
  0xce   : > { %v479_v39 = vmul.f32 0.044715, %v2070_v35  ;;  %v510_v0 = vmul.f32 0.7978846, %v502_v56  ;;  %v1662_v14 = vpop.eup %1661  ;;  %v471_v37 = vmul.f32 0.5, %v2070_v35 }
  0xcf   : > { %v525_v23 = vadd.f32 1.0, %v1662_v14 }
  0xd0   : > { %v487_v44 = vmul.f32 %v479_v39, %v2070_v35  ;;  %1663 = vtanh.f32 %v510_v0 }
  0xd1   : > { %v2106_v38 = vmul.f32 %v525_v23, %v469_v29  ;;  %v664_v23 = vpop.xlane.xlu0 %663 }
  0xd2   : > { %v495_v51 = vmul.f32 %v487_v44, %v2070_v35 }
  0xd3   : > { %v458_v45 = vpop.f32.mrf.mxu0 }
  0xd4   : > { %v459_v47 = vadd.f32 %v1659_v30, %v458_v45  ;;  %v503_v60 = vadd.f32 %v495_v51, %v2070_v35 }
  0xd6   : > { %v480_v52 = vmul.f32 0.044715, %v459_v47  ;;  %v511_v5 = vmul.f32 0.7978846, %v503_v60  ;;  %v1664_v17 = vpop.eup %1663  ;;  %v472_v41 = vmul.f32 0.5, %v459_v47 }
  0xd7   : > { %v526_v24 = vadd.f32 1.0, %v1664_v17 }
  0xd8   : > { %v488_v55 = vmul.f32 %v480_v52, %v459_v47  ;;  %1665 = vtanh.f32 %v511_v5  ;;  %v475_v52 = vmul.f32 0.5, %v2091_v59 }
  0xda   : > { %v496_v61 = vmul.f32 %v488_v55, %v459_v47 }
  0xdb   : > { %v460_v7 = vpop.f32.mrf.mxu0 }
  0xdc   : > { %v504_v63 = vadd.f32 %v496_v61, %v459_v47  ;;  %v461_v11 = vadd.f32 %v1659_v30, %v460_v7  ;;  %v470_v30 = vmul.f32 0.5, %v2067_v32  ;;  %v803_v32 = vpack.c.bf16 %v2106_v38, %v2106_v38 }
  0xdd   : > { %v474_v47 = vmul.f32 0.5, %v2078_v42 }
  0xde   : > { %v512_v6 = vmul.f32 0.7978846, %v504_v63  ;;  %v481_v16 = vmul.f32 0.044715, %v461_v11  ;;  %v1666_v18 = vpop.eup %1665  ;;  %v2108_v39 = vmul.f32 %v526_v24, %v470_v30  ;;  %v830_v54 = vunpack.c.l.b16 %v803_v32 }
  0xdf   : > { %v527_v28 = vadd.f32 1.0, %v1666_v18  ;;  %v473_v61 = vmul.f32 0.5, %v461_v11  ;;  %v2149_v24 = vmax.f32 %v664_v23, 1.0 }
  0xe0   : > { %1667 = vtanh.f32 %v512_v6  ;;  %v489_v20 = vmul.f32 %v481_v16, %v461_v11  ;;  %v804_v35 = vpack.c.bf16 %v2108_v39, %v2108_v39  ;;  %v837_v0 = vrot.slane %v830_v54, 7 }
  0xe1   : > { %1669 = vtanh.f32 %v508_v8  ;;  %v2110_v45 = vmul.f32 %v527_v28, %v471_v37  ;;  %v2153_v30 = vrot.slane %v2149_v24, 6 }
  0xe2   : > { %1671 = vtanh.f32 %v514_v13  ;;  %v497_v25 = vmul.f32 %v489_v20, %v461_v11  ;;  %v831_v57 = vunpack.c.l.b16 %v804_v35 }
  0xe3   : > { %1673 = vtanh.f32 %v515_v19  ;;  %v805_v51 = vpack.c.bf16 %v2110_v45, %v2110_v45  ;;  %vm777_vm14 = vweird.f32 %v2153_v30 }
  0xe4   : > { %v505_v34 = vadd.f32 %v497_v25, %v461_v11  ;;  %v840_v4 = vrot.slane %v831_v57, 6  ;;  %v667_v25 = vrot.slane %v2149_v24, 1 }
  0xe5   : > { %v832_v60 = vunpack.c.l.b16 %v805_v51  ;;  %v1538_v51 = vld [vmem:[%s2035_s19 + $0x30] sm:$0xf] }
  0xe6   : > { %v1668_v22 = vpop.eup %1667  ;;  %v513_v43 = vmul.f32 0.7978846, %v505_v34  ;;  %v2159_v34 = vrot.slane %v2149_v24, 3  ;;  %vm702_vm10 = vweird.f32 %v667_v25  ;;  %v708_v35 = vand.u32 2147483648, %v667_v25 }
  0xe7   : > { %v1670_v27 = vpop.eup %1669  ;;  %v528_v33 = vadd.f32 1.0, %v1668_v22  ;;  %v843_v6 = vrot.slane %v832_v60, 5 }
  0xe8   : > { %v524_v40 = vadd.f32 1.0, %v1670_v27  ;;  %v1672_v44 = vpop.eup %1671  ;;  %1675 = vtanh.f32 %v513_v43  ;;  %v568_v27 = vpop.permute.xlu2 %567  ;;  %v709_v60 = vor.u32 1.1754944e-38, %v708_v35  ;;  %vm732_vm0 = vweird.f32 %v2159_v34 }
  0xe9   : > { %v1674_v46 = vpop.eup %1673  ;;  %v2113_v48 = vmul.f32 %v528_v33, %v472_v41  ;;  %v530_v50 = vadd.f32 1.0, %v1672_v44  ;;  %1677 = vrcp.f32 %v667_v25  ;;  %v2156_v33 = vrot.slane %v2149_v24, 7 }
  0xea   : > { %v2119_v49 = vmul.f32 %v524_v40, %v468_v31  ;;  %v531_v36 = vadd.f32 1.0, %v1674_v46  ;;  %1679 = vrcp.f32 %v2153_v30  ;;  %v547_v40 = vpop.permute.xlu1 %546  ;;  %v2167_v44 = vrot.slane %v2149_v24, 4 }
  0xeb   : > { %v806_v53 = vpack.c.bf16 %v2113_v48, %v2113_v48  ;;  %v2129_v58 = vmul.f32 %v530_v50, %v474_v47  ;;  %1681 = vrcp.f32 %v2156_v33 }
  0xec   : > { %v802_v56 = vpack.c.bf16 %v2119_v49, %v2119_v49  ;;  %v2131_v42 = vmul.f32 %v531_v36, %v475_v52  ;;  %1683 = vrcp.f32 %v2159_v34  ;;  %v597_v46 = vmul.f32 %v547_v40, %v2119_v49  ;;  %v554_v36 = vpop.permute.xlu0 %553  ;;  %v1578_v40 = vld [vmem:[%s2035_s19 + $0x38] sm:$0xf0] }
  0xed   : > { %v833_v63 = vunpack.c.l.b16 %v806_v53  ;;  %v808_v59 = vpack.c.bf16 %v2129_v58, %v2129_v58  ;;  %1685 = vrcp.f32 %v2167_v44  ;;  %v706_v52 = vand.u32 2147483647, %v667_v25 }
  0xee   : > { %v1676_v55 = vpop.eup %1675  ;;  %v809_v2 = vpack.c.bf16 %v2131_v42, %v2131_v42  ;;  %v829_v5 = vunpack.c.l.b16 %v802_v56  ;;  %v605_v50 = vsel %vm2585_vm2, %v597_v46, 0.0  ;;  %1687 = vrcp.f32 %v2149_v24 }
  0xef   : > { %v529_v62 = vadd.f32 1.0, %v1676_v55  ;;  %v846_v8 = vrot.slane %v833_v63, 4  ;;  %v835_v9 = vunpack.c.l.b16 %v808_v59  ;;  %v1678_v28 = vpop.eup %1677  ;;  %v606_v56 = vrot.slane %v605_v50, 4 }
  0xf0   : > { %v839_v10 = vsel %vm838_vm3, %v837_v0, %v829_v5  ;;  %v836_v11 = vunpack.c.l.b16 %v809_v2  ;;  %v698_v29 = vmul.f32 %v1678_v28, %v667_v25  ;;  %v2162_v41 = vpop.permute.xlu2 %574  ;;  %v2170_v31 = vpop.eup %1679  ;;  %vm703_vm11 = vweird.f32 %v1678_v28 }
  0xf1   : > { %v2137_v3 = vmul.f32 %v529_v62, %v473_v61  ;;  %v842_v13 = vsel %vm841_vm4, %v840_v4, %v839_v10  ;;  %v852_v16 = vrot.slane %v835_v9, 2  ;;  %v2173_v47 = vpop.eup %1681  ;;  %vm2176_vm12 = vmor %vm702_vm10, %vm703_vm11  ;;  %v773_v49 = vmul.f32 %v2170_v31, %v2153_v30 }
  0xf2   : > { %v845_v14 = vsel %vm2590_vm5, %v843_v6, %v842_v13  ;;  %v855_v18 = vrot.slane %v836_v11, 1  ;;  %v699_v37 = vsub.f32 1.0, %v698_v29  ;;  %v2182_v53 = vpop.eup %1683  ;;  %v582_v54 = vpop.permute.xlu1 %581  ;;  %v598_v61 = vmul.f32 %v554_v36, %v2106_v38 }
  0xf3   : > { %v807_v7 = vpack.c.bf16 %v2137_v3, %v2137_v3  ;;  %v848_v17 = vsel %vm2589_vm6, %v846_v8, %v845_v14  ;;  %v728_v62 = vmul.f32 %v2182_v53, %v2159_v34  ;;  %vm707_vm13 = vcmp.eq.f32.partialorder %v706_v52, 8.507059e+37  ;;  %v2191_v0 = vpop.eup %1685  ;;  %v1579_v52 = vld [vmem:[%s2035_s19 + $0x40] sm:$0xf0] }
  0xf4   : > { %v700_v43 = vmul.f32 %v1678_v28, %v699_v37  ;;  %v774_v63 = vsub.f32 1.0, %v773_v49  ;;  %v788_v59 = vmul.f32 %v2173_v47, %v2156_v33  ;;  %v599_v2 = vmul.f32 %v561_v26, %v2108_v39  ;;  %v1530_v37 = vld [vmem:[%s2035_s19 + $0x28] sm:$0xf] }
  0xf5   : > { %v834_v12 = vunpack.c.l.b16 %v807_v7  ;;  %v600_v4 = vmul.f32 %v568_v27, %v2110_v45  ;;  %v607_v6 = vadd.f32 %v606_v56, %v605_v50  ;;  %v612_v7 = vsel %vm2585_vm2, %v598_v61, 0.0  ;;  %v1532_v50 = vld [vmem:[%s2035_s19 + $0x3c] sm:$0xf0]  ;;  %v1571_v61 = vld [vmem:[%s2035_s19 + $0x4] sm:$0xf] }
  0xf6   : > { %v701_v32 = vadd.f32 %v1678_v28, %v700_v43  ;;  %v783_v8 = vand.u32 2147483648, %v2153_v30  ;;  %v729_v9 = vsub.f32 1.0, %v728_v62  ;;  %v2203_v10 = vmul.f32 %v2191_v0, %v2167_v44  ;;  %v1576_v43 = vld [vmem:[%s2035_s19 + $0x2c] sm:$0xf]  ;;  %v1512_v62 = vld [vmem:[%s2035_s19 + $0x14] sm:$0xf0] }
  0xf7   : > { %v849_v15 = vrot.slane %v834_v12, 3  ;;  %v775_v39 = vmul.f32 %v2170_v31, %v774_v63  ;;  %v789_v11 = vsub.f32 1.0, %v788_v59  ;;  %v619_v45 = vsel %vm2585_vm2, %v599_v2, 0.0  ;;  %v1518_v63 = vld [vmem:[%s2035_s19 + $0x8] sm:$0xf] }
  0xf8   : > { %v589_v55 = vpop.permute.xlu2 %588  ;;  %v705_v57 = vsel %vm2176_vm12, %v1678_v28, %v701_v32  ;;  %v2210_v13 = vrot.slane %v2149_v24, 2  ;;  %v613_v14 = vrot.slane %v612_v7, 4  ;;  %vm778_vm15 = vweird.f32 %v2170_v31  ;;  %v1574_v59 = vld [vmem:[%s2035_s19 + $0x18] sm:$0xf0] }
  0xf9   : > { %v851_v19 = vsel %vm2588_vm7, %v849_v15, %v848_v17  ;;  %v603_v5 = vmul.f32 %v589_v55, %v2129_v58  ;;  %v2197_v38 = vsel %vm707_vm13, %v709_v60, %v705_v57  ;;  %v626_v58 = vsel %vm2585_vm2, %v600_v4, 0.0  ;;  %v1510_v57 = vld [vmem:[%s2035_s19] sm:$0xf]  ;;  %v1573_v60 = vld [vmem:[%s2035_s19 + $0x10] sm:$0xf0]  ;;  %vm2254_vm10 = vmor %vm777_vm14, %vm778_vm15 }
  0xfa   : > { %v854_v20 = vsel %vm2587_vm8, %v852_v16, %v851_v19  ;;  %v2215_v15 = vrot.slane %v2149_v24, 5  ;;  %v608_v16 = vrot.slane %v607_v6, 2  ;;  %v781_v17 = vand.u32 2147483647, %v2153_v30  ;;  %v596_v26 = vpop.permute.xlu1 %595 }
  0xfb   : > { %v857_v21 = vsel %vm2586_vm9, %v855_v18, %v854_v20  ;;  %v647_v12 = vsel %vm2585_vm2, %v603_v5, 0.0  ;;  %v2218_v18 = vor.u32 1.1754944e-38, %v783_v8  ;;  %v796_v19 = vand.u32 2147483647, %v2156_v33  ;;  %v2221_v20 = vpop.eup %1687 }
  0xfc   : > { %v858_v22 = vpack.c.b16 %v857_v21, %v857_v21  ;;  %v620_v21 = vrot.slane %v619_v45, 4  ;;  %v744_v23 = vsub.f32 1.0, %v2203_v10  ;;  %v648_v25 = vrot.slane %v647_v12, 4 }
  0xfd   : > { %v730_v27 = vmul.f32 %v2182_v53, %v729_v9  ;;  %v2226_v28 = vadd.f32 %v2170_v31, %v775_v39  ;;  %v790_v29 = vmul.f32 %v2173_v47, %v789_v11  ;;  %1689 = vrcp.f32 %v2210_v13 }
  0xfe   : > { %1507 = vmatmul.msk.bf16.vlgmr.msrb.gmra.mxu1 %vm2585_vm2, %v858_v22  ;;  %v627_v22 = vrot.slane %v626_v58, 4  ;;  %v614_v46 = vadd.f32 %v613_v14, %v612_v7  ;;  %v601_v32 = vmul.f32 %v2162_v41, %v2113_v48  ;;  %v1531_v35 = vor.u32 %v1578_v40, %v1530_v37 }
  0xff   : > { %1691 = vrcp.f32 %v2215_v15  ;;  %v604_v36 = vmul.f32 %v596_v26, %v2131_v42  ;;  %v602_v49 = vmul.f32 %v582_v54, %v2137_v3  ;;  %v1535_v55 = vor.u32 %v1576_v43, %v1532_v50 }
 0x100   : > { %v1539_v56 = vor.u32 %v1579_v52, %v1538_v51  ;;  %vm733_vm1 = vweird.f32 %v2182_v53  ;;  %v649_v48 = vadd.f32 %v648_v25, %v647_v12  ;;  %1024 = vmatpush.bf16.msra.mxu2 %v1531_v35  ;;  %v1511_v41 = vor.u32 %v1573_v60, %v1510_v57 }
 0x101   : > { %v621_v2 = vadd.f32 %v620_v21, %v619_v45  ;;  %v738_v42 = vand.u32 2147483648, %v2159_v34  ;;  %1037 = vmatpush.bf16.msra.mxu3 %v1535_v55  ;;  %v1515_v54 = vor.u32 %v1571_v61, %v1512_v62  ;;  %v1519_v4 = vor.u32 %v1574_v59, %v1518_v63  ;;  %vm2270_vm11 = vmor %vm732_vm0, %vm733_vm1 }
 0x102   : > { %1050 = vmatpush.bf16.msra.mxu1 %v1539_v56  ;;  %v2258_v5 = vadd.f32 %v608_v16, %v607_v6  ;;  %v628_v7 = vadd.f32 %v627_v22, %v626_v58  ;;  %v2261_v8 = vadd.f32 %v2182_v53, %v730_v27  ;;  %v633_v9 = vsel %vm2585_vm2, %v601_v32, 0.0 }
 0x103   : > { %v2264_v10 = vpop.eup %1689  ;;  %v615_v11 = vrot.slane %v614_v46, 2  ;;  %v745_v6 = vmul.f32 %v2191_v0, %v744_v23  ;;  %v654_v45 = vsel %vm2585_vm2, %v604_v36, 0.0  ;;  %v640_v58 = vsel %vm2585_vm2, %v602_v49, 0.0 }
 0x104   : > { %v736_v14 = vand.u32 2147483647, %v2159_v34  ;;  %v780_v16 = vsel %vm2254_vm10, %v2170_v31, %v2226_v28  ;;  %v2285_v21 = vadd.f32 %v2173_v47, %v790_v29  ;;  %vm792_vm12 = vweird.f32 %v2156_v33  ;;  %1025 = vmatpush.bf16.msra.mxu2 %v1511_v41 }
 0x105   : > { %v2277_v12 = vpop.eup %1691  ;;  %vm793_vm13 = vweird.f32 %v2173_v47  ;;  %v683_v22 = vmul.f32 %v2221_v20, %v2149_v24  ;;  %v622_v23 = vrot.slane %v621_v2, 2  ;;  %v2291_v25 = vor.u32 1.1754944e-38, %v738_v42  ;;  %1038 = vmatpush.bf16.msra.mxu3 %v1515_v54 }
 0x106   : > { %v634_v34 = vrot.slane %v633_v9, 4  ;;  %v650_v26 = vrot.slane %v649_v48, 2  ;;  %1051 = vmatpush.bf16.msra.mxu1 %v1519_v4  ;;  %v629_v27 = vrot.slane %v628_v7, 2  ;;  %v735_v29 = vsel %vm2270_vm11, %v2182_v53, %v2261_v8  ;;  %vm2344_vm9 = vmor %vm792_vm12, %vm793_vm13 }
 0x107   : > { %v655_v37 = vrot.slane %v654_v45, 4  ;;  %v641_v40 = vrot.slane %v640_v58, 4  ;;  %v610_v43 = vrot.slane %v2258_v5, 1  ;;  %v2298_v32 = vadd.f32 %v615_v11, %v614_v46 }
 0x108   : > { %v2301_v35 = vadd.f32 %v2191_v0, %v745_v6  ;;  %v753_v50 = vand.u32 2147483648, %v2167_v44  ;;  %vm2304_vm14 = vcmp.eq.f32.partialorder %v736_v14, 8.507059e+37  ;;  %vm2310_vm15 = vcmp.eq.f32.partialorder %v781_v17, 8.507059e+37 }
 0x109   : > { %v798_v53 = vand.u32 2147483648, %v2156_v33  ;;  %v684_v36 = vsub.f32 1.0, %v683_v22  ;;  %v713_v46 = vmul.f32 %v2264_v10, %v2210_v13  ;;  %v758_v49 = vmul.f32 %v2277_v12, %v2215_v15 }
 0x10a   : > { %v2319_v55 = vadd.f32 %v622_v23, %v621_v2  ;;  %v635_v56 = vadd.f32 %v634_v34, %v633_v9  ;;  %vm747_vm0 = vweird.f32 %v2167_v44  ;;  %v2322_v57 = vadd.f32 %v650_v26, %v649_v48 }
 0x10b   : > { %v2324_v30 = vadd.f32 %v629_v27, %v628_v7  ;;  %vm748_vm1 = vweird.f32 %v2191_v0  ;;  %v656_v17 = vadd.f32 %v655_v37, %v654_v45  ;;  %v642_v60 = vadd.f32 %v641_v40, %v640_v58 }
 0x10c   : > { %v617_v61 = vrot.slane %v2298_v32, 1  ;;  %v751_v41 = vand.u32 2147483647, %v2167_v44  ;;  %v2329_v62 = vor.u32 1.1754944e-38, %v753_v50  ;;  %v691_v63 = vand.u32 2147483647, %v2149_v24  ;;  %vm2359_vm5 = vmor %vm747_vm0, %vm748_vm1 }
 0x10d   : > { %v2332_v59 = vor.u32 1.1754944e-38, %v798_v53  ;;  %v685_v2 = vmul.f32 %v2221_v20, %v684_v36  ;;  %v714_v48 = vsub.f32 1.0, %v713_v46  ;;  %v759_v42 = vsub.f32 1.0, %v758_v49 }
 0x10e   : > { %v624_v54 = vrot.slane %v2319_v55, 1  ;;  %v636_v4 = vrot.slane %v635_v56, 2  ;;  %v652_v7 = vrot.slane %v2322_v57, 1  ;;  %vm687_vm11 = vweird.f32 %v2149_v24 }
 0x10f   : > { %v631_v8 = vrot.slane %v2324_v30, 1  ;;  %v657_v9 = vrot.slane %v656_v17, 2  ;;  %v643_v39 = vrot.slane %v642_v60, 2  ;;  %vm688_vm2 = vweird.f32 %v2221_v20 }
 0x110   : > { %vm2348_vm8 = vcmp.eq.f32.partialorder %v691_v63, 8.507059e+37  ;;  %v693_v45 = vand.u32 2147483648, %v2149_v24  ;;  %vm717_vm7 = vweird.f32 %v2210_v13  ;;  %vm718_vm6 = vweird.f32 %v2264_v10  ;;  %vm2379_vm0 = vmor %vm687_vm11, %vm688_vm2  ;;  %v1660_v24 = vld [vmem:[%s816_s21] ss:$0 sm:$0xff] }
 0x111   : > { %vm2363_vm12 = vcmp.eq.f32.partialorder %v751_v41, 8.507059e+37  ;;  %vm2369_vm13 = vcmp.eq.f32.partialorder %v796_v19, 8.507059e+37  ;;  %v686_v23 = vadd.f32 %v2221_v20, %v685_v2  ;;  %v715_v34 = vmul.f32 %v2264_v10, %v714_v48  ;;  %vm2395_vm2 = vmor %vm717_vm7, %vm718_vm6  ;;  %v1575_v41 = vld [vmem:[%s2035_s19 + $0x20] sm:$0xf0] }
 0x112   : > { %v721_v44 = vand.u32 2147483647, %v2210_v13  ;;  %v760_v26 = vmul.f32 %v2277_v12, %v759_v42  ;;  %v637_v27 = vadd.f32 %v636_v4, %v635_v56  ;;  %v723_v33 = vand.u32 2147483648, %v2210_v13 }
 0x113   : > { %vm762_vm1 = vweird.f32 %v2215_v15  ;;  %v768_v19 = vand.u32 2147483648, %v2215_v15  ;;  %v658_v40 = vadd.f32 %v657_v9, %v656_v17  ;;  %v644_v50 = vadd.f32 %v643_v39, %v642_v60  ;;  %v1577_v17 = vld [vmem:[%s2035_s19 + $0x34] sm:$0xf]  ;;  %v1526_v60 = vld [vmem:[%s2035_s19 + $0x10] sm:$0xf] }
 0x114   : > { %vm763_vm11 = vweird.f32 %v2277_v12  ;;  %v766_v36 = vand.u32 2147483647, %v2215_v15  ;;  %v611_v46 = vadd.f32 %v610_v43, %v2258_v5  ;;  %v740_v49 = vsel %vm2304_vm14, %v2291_v25, %v735_v29  ;;  %v1540_v5 = vld [vmem:[%s2035_s19 + $0x44] sm:$0xf0]  ;;  %v1546_v43 = vld [vmem:[%s2035_s19 + $0x38] sm:$0xf] }
 0x115   : > { %v785_v13 = vsel %vm2310_vm15, %v2218_v18, %v780_v16  ;;  %v795_v56 = vsel %vm2344_vm9, %v2173_v47, %v2285_v21  ;;  %v750_v3 = vsel %vm2359_vm5, %v2191_v0, %v2301_v35  ;;  %v716_v31 = vadd.f32 %v2264_v10, %v715_v34  ;;  %v1580_v16 = vld [vmem:[%s2035_s19 + $0x48] sm:$0xf0]  ;;  %v1520_v29 = vld [vmem:[%s2035_s19 + $0x1c] sm:$0xf0]  ;;  %vm2436_vm5 = vmor %vm762_vm1, %vm763_vm11 }
 0x116   : > { %v761_v28 = vadd.f32 %v2277_v12, %v760_v26  ;;  %v1543_v18 = vor.u32 %v1577_v17, %v1540_v5  ;;  %v1572_v25 = vld [vmem:[%s2035_s19 + $0xc] sm:$0xf]  ;;  %v638_v51 = vrot.slane %v637_v27, 1  ;;  %v690_v21 = vsel %vm2379_vm0, %v2221_v20, %v686_v23 }
 0x117   : > { %v694_v52 = vor.u32 1.1754944e-38, %v693_v45  ;;  %v1547_v35 = vor.u32 %v1580_v16, %v1546_v43  ;;  %v659_v63 = vrot.slane %v658_v40, 1  ;;  %v645_v2 = vrot.slane %v644_v50, 1 }
 0x118   : > { %1063 = vmatpush.bf16.msrb.mxu2 %v1543_v18  ;;  %v1523_v42 = vor.u32 %v1572_v25, %v1520_v29  ;;  %vm2442_vm6 = vcmp.eq.f32.partialorder %v721_v44, 8.507059e+37  ;;  %v724_v20 = vor.u32 1.1754944e-38, %v723_v33  ;;  %v769_v9 = vor.u32 1.1754944e-38, %v768_v19 }
 0x119   : > { %1076 = vmatpush.bf16.msrb.mxu3 %v1547_v35  ;;  %v1527_v15 = vor.u32 %v1575_v41, %v1526_v60  ;;  %v720_v39 = vsel %vm2395_vm2, %v2264_v10, %v716_v31  ;;  %v765_v11 = vsel %vm2436_vm5, %v2277_v12, %v761_v28  ;;  %vm767_vm7 = vcmp.eq.f32.partialorder %v766_v36, 8.507059e+37 }
 0x11a   : > { %v625_v45 = vadd.f32 %v624_v54, %v2319_v55  ;;  %v632_v58 = vadd.f32 %v631_v8, %v2324_v30  ;;  %v618_v23 = vadd.f32 %v617_v61, %v2298_v32  ;;  %v653_v10 = vadd.f32 %v652_v7, %v2322_v57 }
 0x11b   : > { %v639_v34 = vadd.f32 %v638_v51, %v637_v27  ;;  %v660_v44 = vadd.f32 %v659_v63, %v658_v40  ;;  %v646_v12 = vadd.f32 %v645_v2, %v644_v50  ;;  %v695_v26 = vsel %vm2348_vm8, %v694_v52, %v690_v21 }
 0x11c   : > { %1064 = vmatpush.bf16.msrb.mxu2 %v1523_v42  ;;  %v755_v55 = vsel %vm2363_vm12, %v2329_v62, %v750_v3  ;;  %v800_v30 = vsel %vm2369_vm13, %v2332_v59, %v795_v56  ;;  %v725_v32 = vsel %vm2442_vm6, %v724_v20, %v720_v39  ;;  %v770_v61 = vsel %vm767_vm7, %v769_v9, %v765_v11 }
 0x11d   : > { %1077 = vmatpush.bf16.msrb.mxu3 %v1527_v15  ;;  %v741_v57 = vmul.f32 %v740_v49, %v632_v58  ;;  %v711_v54 = vmul.f32 %v2197_v38, %v618_v23  ;;  %v786_v7 = vmul.f32 %v785_v13, %v653_v10  ;;  %v696_v6 = vmul.f32 %v695_v26, %v611_v46 }
 0x11e   : > { %v756_v37 = vmul.f32 %v755_v55, %v639_v34  ;;  %v801_v33 = vmul.f32 %v800_v30, %v660_v44  ;;  %v726_v14 = vmul.f32 %v725_v32, %v625_v45  ;;  %v771_v62 = vmul.f32 %v770_v61, %v646_v12 }
 0x11f   : > { %vm2621_vm8 = vcmask 1043459   ;;  %vm2622_vm9 = vcmask 1044484   ;;  %vm2623_vm10 = vcmask 1045509   ;;  %vm2624_vm14 = vcmask 1046534  }
 0x120   : > { %vm2625_vm15 = vcmask 1047559   ;;  %vm2626_vm12 = vcmask 261120  }
 0x17b   : > { %v883_v47 = vpop.f32.mrf.mxu1 }
 0x17c   : > { %v884_v48 = vadd.f32 %v1660_v24, %v883_v47 }
 0x17e   : > { %1693 = vtanh.f32 %v884_v48 }
 0x183   : > { %v885_v8 = vpop.f32.mrf.mxu1 }
 0x184   : > { %v1694_v27 = vpop.eup %1693 }
 0x185   : > { %v889_v19 = vrot.slane %v1694_v27, 1  ;;  %v890_v40 = vrot.slane %v1694_v27, 2  ;;  %v891_v22 = vrot.slane %v1694_v27, 3  ;;  %v892_v59 = vrot.slane %v1694_v27, 4 }
 0x186   : > { %v893_v50 = vrot.slane %v1694_v27, 5  ;;  %v894_v24 = vrot.slane %v1694_v27, 6  ;;  %v895_v53 = vrot.slane %v1694_v27, 7  ;;  %v904_v36 = vadd.f32 %v1694_v27, %v696_v6 }
 0x187   : > { %v905_v56 = vadd.f32 %v889_v19, %v711_v54  ;;  %v906_v49 = vadd.f32 %v890_v40, %v726_v14  ;;  %v907_v17 = vadd.f32 %v891_v22, %v741_v57  ;;  %v908_v38 = vadd.f32 %v892_v59, %v756_v37 }
 0x188   : > { %v909_v13 = vadd.f32 %v893_v50, %v771_v62  ;;  %v910_v5 = vadd.f32 %v894_v24, %v786_v7  ;;  %v911_v46 = vadd.f32 %v895_v53, %v801_v33  ;;  %v912_v43 = vpack.c.bf16 %v904_v36, %v904_v36 }
 0x189   : > { %v913_v3 = vpack.c.bf16 %v905_v56, %v905_v56  ;;  %v914_v31 = vpack.c.bf16 %v906_v49, %v906_v49  ;;  %v915_v28 = vpack.c.bf16 %v907_v17, %v907_v17  ;;  %v916_v18 = vpack.c.bf16 %v908_v38, %v908_v38 }
 0x18a   : > { %v917_v16 = vpack.c.bf16 %v909_v13, %v909_v13  ;;  %v918_v25 = vpack.c.bf16 %v910_v5, %v910_v5  ;;  %v919_v29 = vpack.c.bf16 %v911_v46, %v911_v46  ;;  %v940_v0 = vunpack.c.l.b16 %v912_v43 }
 0x18b   : > { %v941_v51 = vunpack.c.l.b16 %v913_v3  ;;  %v942_v47 = vunpack.c.l.b16 %v914_v31  ;;  %v943_v21 = vunpack.c.l.b16 %v915_v28  ;;  %v944_v52 = vunpack.c.l.b16 %v916_v18 }
 0x18c   : > { %v945_v35 = vunpack.c.l.b16 %v917_v16  ;;  %v946_v63 = vunpack.c.l.b16 %v918_v25  ;;  %v947_v2 = vunpack.c.l.b16 %v919_v29 }
 0x18d   : > { %v948_v60 = vrot.slane %v941_v51, 7  ;;  %v950_v41 = vrot.slane %v942_v47, 6  ;;  %v952_v42 = vrot.slane %v943_v21, 5  ;;  %v954_v20 = vrot.slane %v944_v52, 4 }
 0x18e   : > { %v956_v15 = vrot.slane %v945_v35, 3  ;;  %v958_v11 = vrot.slane %v946_v63, 2  ;;  %v960_v58 = vrot.slane %v947_v2, 1 }
 0x18f   : > { %v949_v48 = vsel %vm838_vm3, %v948_v60, %v940_v0  ;;  %vm2627_vm3 = vmmov %vm2626_vm12 }
 0x190   : > { %v951_v4 = vsel %vm841_vm4, %v950_v41, %v949_v48  ;;  %vm2628_vm4 = vmmov %vm2627_vm3 }
 0x191   : > { %v953_v9 = vsel %vm2621_vm8, %v952_v42, %v951_v4  ;;  %vm2629_vm13 = vmmov %vm2627_vm3 }
 0x192   : > { %v955_v39 = vsel %vm2622_vm9, %v954_v20, %v953_v9  ;;  %vm2630_vm0 = vmmov %vm2627_vm3 }
 0x193   : > { %v957_v45 = vsel %vm2623_vm10, %v956_v15, %v955_v39 }
 0x194   : > { %v959_v23 = vsel %vm2624_vm14, %v958_v11, %v957_v45 }
 0x195   : > { %v961_v10 = vsel %vm2625_vm15, %v960_v58, %v959_v23 }
 0x196   : > { %v962_v34 = vpack.c.b16 %v961_v10, %v961_v10 }
 0x198   : > { %1548 = vmatmul.msk.bf16.vlgmr.msra.gmra.mxu2 %vm2626_vm12, %v962_v34  ;;  %1549 = vmatmul.msk.bf16.vlgmr.msra.gmra.mxu3 %vm2627_vm3, %v962_v34 }
 0x199   : > { %1550 = vmatmul.msk.bf16.vlgmr.msra.gmra.mxu1 %vm2628_vm4, %v962_v34 }
 0x1a8   : > { %1551 = vmatmul.msk.bf16.vlgmr.msrb.gmra.mxu2 %vm2629_vm13, %v962_v34  ;;  %1552 = vmatmul.msk.bf16.vlgmr.msrb.gmra.mxu3 %vm2630_vm0, %v962_v34 }
 0x216   : > { %v2487_v44 = vpop.f32.mrf.mxu1 }
 0x21b   : > { %v1027_v12 = vpop.f32.mrf.mxu2  ;;  %v1040_v26 = vpop.f32.mrf.mxu3 }
 0x21e   : > { %v1055_v55 = vpop.f32.mrf.mxu1 }
 0x223   : > { %v1029_v30 = vpop.f32.mrf.mxu2  ;;  %v1042_v32 = vpop.f32.mrf.mxu3 }
 0x22b   : > { %v2489_v61 = vpop.f32.mrf.mxu2  ;;  %v1079_v57 = vpop.f32.mrf.mxu3 }
 0x22f   : > { %1086 = sbr.rel (%p1553_p9) target bundleno = 571 (0x23b), region = 67 }
 0x233   : > { %v1068_v54 = vpop.f32.mrf.mxu2  ;;  %v1081_v7 = vpop.f32.mrf.mxu3 }
 0x234   : > { %v1922_v8 = vmov 0.0  }
 0x235   : > { %1087 = vst [vmem:[#allocation11] sm:$0xff] %v1922_v8 }
 0x236   : > { %1088 = vst [vmem:[#allocation11 + $0x8] sm:$0xff] %v1922_v8 }
 0x237   : > { %1089 = vst [vmem:[#allocation11 + $0x10] sm:$0xff] %v1922_v8 }
 0x238   : > { %1090 = vst [vmem:[#allocation11 + $0x18] sm:$0xff] %v1922_v8 }
 0x239   : > { %1091 = vst [vmem:[#allocation11 + $0x20] sm:$0xff] %v1922_v8 }
 0x23a   : > { %1092 = vst [vmem:[#allocation3] sm:$0xff] %v1922_v8 }
 0x23b PF: > { %v2493_v6 = vand.u32 127, %v542_v1  ;;  %p1558_p10 = scmp.ne.s32.totalorder %s1903_s13, 2 }
 0x23c   : > { %v1121_v51 = vld [vmem:[#allocation11] sm:$0xff] }
 0x23d   : > { %vm1095_vm1 = vcmp.lt.s32.totalorder %v2493_v6, 8  ;;  %vm1235_vm2 = vcmp.lt.s32.totalorder %v2493_v6, 3  ;;  %v1169_v20 = vld [vmem:[#allocation11 + $0x8] sm:$0xff] }
 0x23e   : > { %v1098_v27 = vsel %vm1095_vm1, %v1027_v12, -1e+30  ;;  %v1146_v37 = vsel %vm1095_vm1, %v1040_v26, -1e+30  ;;  %v1238_v33 = vsel %vm1235_vm2, %v1079_v57, -1e+30 }
 0x23f   : > { %1099 = vmax.xlane.f32.xlu0 %v1098_v27  ;;  %1239 = vmax.xlane.f32.xlu2 %v1238_v33 }
 0x240   : > { %v1267_v57 = vld [vmem:[#allocation11 + $0x20] sm:$0xff] }
 0x247   : > { %1147 = vmax.xlane.f32.xlu0 %v1146_v37 }
 0x2b2   : > { %v1100_v14 = vpop.xlane.xlu0 %1099  ;;  %v1240_v24 = vpop.xlane.xlu2 %1239 }
 0x2b3   : > { %v1101_v62 = vsub.f32 %v1098_v27, %v1100_v14  ;;  %v1241_v53 = vsub.f32 %v1238_v33, %v1240_v24 }
 0x2b5   : > { %v1102_v19 = vmul.f32 1.442695, %v1101_v62  ;;  %v1242_v36 = vmul.f32 1.442695, %v1241_v53 }
 0x2b7   : > { %1695 = vpow2.f32 %v1102_v19 }
 0x2ba   : > { %v1148_v1 = vpop.xlane.xlu0 %1147 }
 0x2bb   : > { %v1149_v40 = vsub.f32 %v1146_v37, %v1148_v1 }
 0x2bd   : > { %v1696_v22 = vpop.eup %1695  ;;  %v1150_v59 = vmul.f32 1.442695, %v1149_v40 }
 0x2be   : > { %1104 = vadd.xlane.f32.xlu1 %v1696_v22 }
 0x2bf   : > { %1697 = vpow2.f32 %v1150_v59 }
 0x2c0   : > { %1699 = vpow2.f32 %v1242_v36 }
 0x2c5   : > { %v1698_v50 = vpop.eup %1697 }
 0x2c6   : > { %1152 = vadd.xlane.f32.xlu1 %v1698_v50  ;;  %v2501_v56 = vpop.eup %1699 }
 0x2ce   : > { %1244 = vadd.xlane.f32.xlu1 %v2501_v56 }
 0x331   : > { %v1105_v49 = vpop.xlane.xlu1 %1104 }
 0x332   : > { %1701 = vrcp.f32 %v1105_v49  ;;  %v1117_v46 = vand.u32 2147483648, %v1105_v49  ;;  %v1115_v3 = vand.u32 2147483647, %v1105_v49  ;;  %vm1111_vm5 = vweird.f32 %v1105_v49 }
 0x334   : > { %v1118_v18 = vor.u32 1.1754944e-38, %v1117_v46  ;;  %vm1116_vm7 = vcmp.eq.f32.partialorder %v1115_v3, 8.507059e+37  ;;  %v1556_v3 = vmul.f32 -1.442695, %v2487_v44 }
 0x338   : > { %v1702_v17 = vpop.eup %1701 }
 0x339   : > { %v1107_v38 = vmul.f32 %v1702_v17, %v1105_v49  ;;  %v1153_v13 = vpop.xlane.xlu1 %1152  ;;  %vm1112_vm11 = vweird.f32 %v1702_v17 }
 0x33a   : > { %1703 = vrcp.f32 %v1153_v13  ;;  %vm1113_vm6 = vmor %vm1111_vm5, %vm1112_vm11  ;;  %v1165_v52 = vand.u32 2147483648, %v1153_v13  ;;  %v1163_v0 = vand.u32 2147483647, %v1153_v13  ;;  %vm1159_vm9 = vweird.f32 %v1153_v13 }
 0x33b   : > { %v1108_v5 = vsub.f32 1.0, %v1107_v38 }
 0x33c   : > { %v1166_v48 = vor.u32 1.1754944e-38, %v1165_v52  ;;  %vm1164_vm14 = vcmp.eq.f32.partialorder %v1163_v0, 8.507059e+37 }
 0x33d   : > { %v1109_v43 = vmul.f32 %v1702_v17, %v1108_v5 }
 0x33f   : > { %v1110_v31 = vadd.f32 %v1702_v17, %v1109_v43 }
 0x340   : > { %v1704_v28 = vpop.eup %1703 }
 0x341   : > { %v1155_v16 = vmul.f32 %v1704_v28, %v1153_v13  ;;  %v1114_v25 = vsel %vm1113_vm6, %v1702_v17, %v1110_v31  ;;  %vm1160_vm8 = vweird.f32 %v1704_v28  ;;  %v1245_v45 = vpop.xlane.xlu1 %1244  ;;  %v1557_v31 = vmul.f32 -1.442695, %v2489_v61 }
 0x342   : > { %v1119_v29 = vsel %vm1116_vm7, %v1118_v18, %v1114_v25  ;;  %vm1161_vm10 = vmor %vm1159_vm9, %vm1160_vm8  ;;  %1705 = vrcp.f32 %v1245_v45  ;;  %v1257_v10 = vand.u32 2147483648, %v1245_v45  ;;  %vm1251_vm15 = vweird.f32 %v1245_v45 }
 0x343   : > { %v1156_v47 = vsub.f32 1.0, %v1155_v16  ;;  %v1120_v21 = vmul.f32 %v1696_v22, %v1119_v29  ;;  %v1255_v12 = vand.u32 2147483647, %v1245_v45  ;;  %vm1141_vm9 = vcmp.eq.s32.totalorder %v2493_v6, 0 }
 0x344   : > { %v1258_v55 = vor.u32 1.1754944e-38, %v1257_v10 }
 0x345   : > { %v1157_v35 = vmul.f32 %v1704_v28, %v1156_v47  ;;  %v1124_v60 = vadd.f32 1e-08, %v1120_v21  ;;  %v1122_v41 = vadd.f32 %v1121_v51, %v1120_v21  ;;  %vm1256_vm4 = vcmp.eq.f32.partialorder %v1255_v12, 8.507059e+37 }
 0x346   : > { %v1923_v12 = vmov 0.0  }
 0x347   : > { %v1126_v63 = vsel %vm1095_vm1, %v1124_v60, 0.0  ;;  %1123 = vst [vmem:[#allocation11] sm:$0xff] %v1122_v41  ;;  %v1158_v2 = vadd.f32 %v1704_v28, %v1157_v35  ;;  %v1125_v27 = vsel %vm1095_vm1, %v1124_v60, 1.0 }
 0x348   : > { %1127 = vadd.xlane.f32.xlu2 %v1126_v63  ;;  %v1706_v58 = vpop.eup %1705  ;;  %1707 = vlog2.f32 %v1125_v27 }
 0x349   : > { %v1162_v42 = vsel %vm1161_vm10, %v1704_v28, %v1158_v2  ;;  %v1247_v23 = vmul.f32 %v1706_v58, %v1245_v45  ;;  %vm1252_vm12 = vweird.f32 %v1706_v58  ;;  %vm1189_vm10 = vcmp.eq.s32.totalorder %v2493_v6, 1 }
 0x34a   : > { %v1167_v4 = vsel %vm1164_vm14, %v1166_v48, %v1162_v42  ;;  %vm1253_vm3 = vmor %vm1251_vm15, %vm1252_vm12 }
 0x34b   : > { %v1168_v9 = vmul.f32 %v1698_v50, %v1167_v4  ;;  %v1248_v34 = vsub.f32 1.0, %v1247_v23 }
 0x34d   : > { %v1172_v15 = vadd.f32 1e-08, %v1168_v9  ;;  %v1170_v39 = vadd.f32 %v1169_v20, %v1168_v9  ;;  %v1249_v26 = vmul.f32 %v1706_v58, %v1248_v34 }
 0x34e   : > { %v1708_v14 = vpop.eup %1707 }
 0x34f   : > { %v1174_v11 = vsel %vm1095_vm1, %v1172_v15, 0.0  ;;  %1171 = vst [vmem:[#allocation11 + $0x8] sm:$0xff] %v1170_v39  ;;  %v1250_v30 = vadd.f32 %v1706_v58, %v1249_v26  ;;  %v1173_v33 = vsel %vm1095_vm1, %v1172_v15, 1.0  ;;  %v1130_v22 = vmul.f32 0.6931472, %v1708_v14  ;;  %v1261_v39 = vld [vmem:[#allocation11 + $0x10] sm:$0xff] }
 0x350   : > { %1175 = vadd.xlane.f32.xlu0 %v1174_v11  ;;  %v1264_v11 = vld [vmem:[#allocation11 + $0x18] sm:$0xff]  ;;  %v2521_v26 = vsel %vm1141_vm9, 1.0, %v1923_v12 }
 0x351   : > { %v1254_v32 = vsel %vm1253_vm3, %v1706_v58, %v1250_v30 }
 0x352   : > { %v1259_v54 = vsel %vm1256_vm4, %v1258_v55, %v1254_v32  ;;  %v2523_v55 = vsel %vm1189_vm10, 1.0, %v1923_v12 }
 0x353   : > { %v1260_v7 = vmul.f32 %v2501_v56, %v1259_v54 }
 0x355   : > { %v1268_v8 = vadd.f32 %v1267_v57, %v1260_v7  ;;  %v1194_v7 = vld [vmem:[#allocation3] sm:$0xff] }
 0x357   : > { %1269 = vst [vmem:[#allocation11 + $0x20] sm:$0xff] %v1268_v8 }
 0x3bb   : > { %v1128_v37 = vpop.xlane.xlu2 %1127 }
 0x3bc   : > { %1709 = vlog2.f32 %v1128_v37 }
 0x3bd   : > { %1711 = vrcp.f32 %v1128_v37 }
 0x3be   : > { %1713 = vlog2.f32 %v1173_v33 }
 0x3c2   : > { %v1710_v62 = vpop.eup %1709 }
 0x3c3   : > { %v1712_v19 = vpop.eup %1711  ;;  %v1132_v1 = vmul.f32 0.6931472, %v1710_v62  ;;  %v1176_v40 = vpop.xlane.xlu0 %1175 }
 0x3c4   : > { %1715 = vlog2.f32 %v1176_v40  ;;  %v1135_v50 = vmul.f32 %v1712_v19, %v1125_v27  ;;  %v1714_v53 = vpop.eup %1713 }
 0x3c5   : > { %1717 = vrcp.f32 %v1176_v40  ;;  %v1133_v59 = vsub.f32 %v1130_v22, %v1132_v1  ;;  %v1178_v38 = vmul.f32 0.6931472, %v1714_v53 }
 0x3c6   : > { %1719 = vpow2.f32 %v1556_v3 }
 0x3c7   : > { %v1136_v24 = vmul.f32 %v1135_v50, %v1133_v59  ;;  %1721 = vpow2.f32 %v1557_v31 }
 0x3c9   : > { %v1137_v36 = vsel %vm1095_vm1, %v1136_v24, 0.0 }
 0x3ca   : > { %v1716_v56 = vpop.eup %1715  ;;  %1138 = vadd.xlane.f32.xlu2 %v1137_v36 }
 0x3cb   : > { %v1718_v49 = vpop.eup %1717  ;;  %v1180_v17 = vmul.f32 0.6931472, %v1716_v56 }
 0x3cc   : > { %v1183_v5 = vmul.f32 %v1718_v49, %v1173_v33  ;;  %v1720_v28 = vpop.eup %1719 }
 0x3cd   : > { %v1181_v13 = vsub.f32 %v1178_v38, %v1180_v17  ;;  %v1722_v18 = vpop.eup %1721  ;;  %v1200_v16 = vadd.f32 1.0, %v1720_v28 }
 0x3ce   : > { %v1219_v25 = vadd.f32 1.0, %v1722_v18 }
 0x3cf   : > { %v1184_v46 = vmul.f32 %v1183_v5, %v1181_v13  ;;  %1723 = vrcp.f32 %v1200_v16  ;;  %v1212_v60 = vand.u32 2147483648, %v1200_v16  ;;  %vm1206_vm13 = vweird.f32 %v1200_v16 }
 0x3d0   : > { %1725 = vrcp.f32 %v1219_v25  ;;  %v1231_v44 = vand.u32 2147483648, %v1219_v25  ;;  %v1210_v61 = vand.u32 2147483647, %v1200_v16  ;;  %vm1225_vm11 = vweird.f32 %v1219_v25 }
 0x3d1   : > { %v1185_v43 = vsel %vm1095_vm1, %v1184_v46, 0.0  ;;  %v1213_v2 = vor.u32 1.1754944e-38, %v1212_v60  ;;  %v1229_v4 = vand.u32 2147483647, %v1219_v25 }
 0x3d2   : > { %1186 = vadd.xlane.f32.xlu0 %v1185_v43  ;;  %vm1211_vm6 = vcmp.eq.f32.partialorder %v1210_v61, 8.507059e+37  ;;  %v1232_v20 = vor.u32 1.1754944e-38, %v1231_v44 }
 0x3d3   : > { %vm1230_vm8 = vcmp.eq.f32.partialorder %v1229_v4, 8.507059e+37 }
 0x3d5   : > { %v1724_v29 = vpop.eup %1723 }
 0x3d6   : > { %v1726_v51 = vpop.eup %1725  ;;  %v1202_v47 = vmul.f32 %v1724_v29, %v1200_v16  ;;  %vm1207_vm0 = vweird.f32 %v1724_v29 }
 0x3d7   : > { %v1221_v21 = vmul.f32 %v1726_v51, %v1219_v25  ;;  %vm1208_vm2 = vmor %vm1206_vm13, %vm1207_vm0  ;;  %vm1226_vm5 = vweird.f32 %v1726_v51 }
 0x3d8   : > { %v1203_v52 = vsub.f32 1.0, %v1202_v47  ;;  %vm1227_vm7 = vmor %vm1225_vm11, %vm1226_vm5 }
 0x3d9   : > { %v1222_v0 = vsub.f32 1.0, %v1221_v21 }
 0x3da   : > { %v1204_v35 = vmul.f32 %v1724_v29, %v1203_v52 }
 0x3db   : > { %v1223_v41 = vmul.f32 %v1726_v51, %v1222_v0 }
 0x3dc   : > { %v1205_v63 = vadd.f32 %v1724_v29, %v1204_v35 }
 0x3dd   : > { %v1224_v48 = vadd.f32 %v1726_v51, %v1223_v41 }
 0x3de   : > { %v1209_v42 = vsel %vm1208_vm2, %v1724_v29, %v1205_v63 }
 0x3df   : > { %v1214_v9 = vsel %vm1211_vm6, %v1213_v2, %v1209_v42  ;;  %v1228_v15 = vsel %vm1227_vm7, %v1726_v51, %v1224_v48 }
 0x3e0   : > { %v1262_v45 = vadd.f32 %v1261_v39, %v1214_v9  ;;  %v1233_v58 = vsel %vm1230_vm8, %v1232_v20, %v1228_v15 }
 0x3e1   : > { %v1265_v23 = vadd.f32 %v1264_v11, %v1233_v58 }
 0x3e2   : > { %1263 = vst [vmem:[#allocation11 + $0x10] sm:$0xff] %v1262_v45 }
 0x3e3   : > { %1266 = vst [vmem:[#allocation11 + $0x18] sm:$0xff] %v1265_v23 }
 0x43d   : > { %v1139_v10 = vpop.xlane.xlu2 %1138 }
 0x43e   : > { %v1140_v34 = vsub.f32 0.0, %v1139_v10 }
 0x440   : > { %v1144_v57 = vmul.f32 %v2521_v26, %v1140_v34 }
 0x445   : > { %v1187_v30 = vpop.xlane.xlu0 %1186 }
 0x446   : > { %v1188_v32 = vsub.f32 0.0, %v1187_v30 }
 0x448   : > { %v1192_v54 = vmul.f32 %v2523_v55, %v1188_v32 }
 0x44a   : > { %v1193_v8 = vadd.f32 %v1192_v54, %v1144_v57  ;;  %1273 = sbr.rel (%p1558_p10) target bundleno = 1372 (0x55c), region = 71 }
 0x44c   : > { %v1195_v27 = vadd.f32 %v1194_v7, %v1193_v8 }
 0x44e   : > { %1196 = vst [vmem:[#allocation3] sm:$0xff] %v1195_v27 }
 0x44f   : > { %v1274_v37 = vld [vmem:[#allocation11] sm:$0xff]  ;;  %v1275_v33 = vld [vmem:[#allocation11 + $0x8] sm:$0xff]  ;;  %v1276_v21 = vld [vmem:[#allocation11 + $0x10] sm:$0xff] }
 0x450   : > { %v1279_v14 = vmul.f32 0.33333334, %v1274_v37  ;;  %v1280_v62 = vmul.f32 0.33333334, %v1275_v33  ;;  %v1277_v52 = vld [vmem:[#allocation11 + $0x18] sm:$0xff]  ;;  %v1278_v0 = vld [vmem:[#allocation11 + $0x20] sm:$0xff] }
 0x451   : > { %v1281_v35 = vmul.f32 0.33333334, %v1276_v21  ;;  %v1282_v60 = vmul.f32 0.33333334, %v1277_v52  ;;  %v1283_v41 = vmul.f32 0.33333334, %v1278_v0 }
 0x452   : > { %v1289_v19 = vadd.f32 1e-08, %v1279_v14  ;;  %1284 = vst [vmem:[#allocation11] sm:$0xff] %v1279_v14  ;;  %v1308_v40 = vadd.f32 1e-08, %v1280_v62 }
 0x453   : > { %1285 = vst [vmem:[#allocation11 + $0x8] sm:$0xff] %v1280_v62 }
 0x454   : > { %v1291_v1 = vsel %vm1095_vm1, %v1289_v19, 0.0  ;;  %v1310_v22 = vsel %vm1095_vm1, %v1308_v40, 0.0  ;;  %v1290_v59 = vsel %vm1095_vm1, %v1289_v19, 1.0  ;;  %v1309_v24 = vsel %vm1095_vm1, %v1308_v40, 1.0  ;;  %1286 = vst [vmem:[#allocation11 + $0x10] sm:$0xff] %v1281_v35 }
 0x455   : > { %1292 = vadd.xlane.f32.xlu0 %v1291_v1  ;;  %1727 = vlog2.f32 %v1290_v59  ;;  %1287 = vst [vmem:[#allocation11 + $0x18] sm:$0xff] %v1282_v60  ;;  %v1327_v61 = vld [vmem:[#allocation3] sm:$0xff] }
 0x456   : > { %1288 = vst [vmem:[#allocation11 + $0x20] sm:$0xff] %v1283_v41  ;;  %v1328_v4 = vmul.f32 0.33333334, %v1327_v61 }
 0x45b   : > { %v1728_v53 = vpop.eup %1727 }
 0x45c   : > { %v1295_v36 = vmul.f32 0.6931472, %v1728_v53 }
 0x45d   : > { %1311 = vadd.xlane.f32.xlu0 %v1310_v22 }
 0x4c8   : > { %v1293_v50 = vpop.xlane.xlu0 %1292 }
 0x4c9   : > { %1729 = vlog2.f32 %v1293_v50 }
 0x4ca   : > { %1731 = vrcp.f32 %v1293_v50 }
 0x4cb   : > { %1733 = vlog2.f32 %v1309_v24 }
 0x4cf   : > { %v1730_v56 = vpop.eup %1729 }
 0x4d0   : > { %v1732_v49 = vpop.eup %1731  ;;  %v1297_v17 = vmul.f32 0.6931472, %v1730_v56  ;;  %v1312_v38 = vpop.xlane.xlu0 %1311 }
 0x4d1   : > { %1735 = vlog2.f32 %v1312_v38  ;;  %v1300_v5 = vmul.f32 %v1732_v49, %v1290_v59  ;;  %v1734_v46 = vpop.eup %1733 }
 0x4d2   : > { %1737 = vrcp.f32 %v1312_v38  ;;  %v1298_v13 = vsub.f32 %v1295_v36, %v1297_v17  ;;  %v1314_v31 = vmul.f32 0.6931472, %v1734_v46 }
 0x4d4   : > { %v1301_v43 = vmul.f32 %v1300_v5, %v1298_v13 }
 0x4d6   : > { %v1302_v3 = vsel %vm1095_vm1, %v1301_v43, 0.0 }
 0x4d7   : > { %v1736_v28 = vpop.eup %1735  ;;  %1303 = vadd.xlane.f32.xlu1 %v1302_v3 }
 0x4d8   : > { %v1738_v18 = vpop.eup %1737  ;;  %v1316_v16 = vmul.f32 0.6931472, %v1736_v28 }
 0x4d9   : > { %v1319_v29 = vmul.f32 %v1738_v18, %v1309_v24 }
 0x4da   : > { %v1317_v25 = vsub.f32 %v1314_v31, %v1316_v16 }
 0x4dc   : > { %v1320_v51 = vmul.f32 %v1319_v29, %v1317_v25 }
 0x4de   : > { %v1321_v47 = vsel %vm1095_vm1, %v1320_v51, 0.0 }
 0x4df   : > { %1322 = vadd.xlane.f32.xlu1 %v1321_v47 }
 0x54a   : > { %v1304_v44 = vpop.xlane.xlu1 %1303 }
 0x54b   : > { %v1305_v63 = vsub.f32 0.0, %v1304_v44 }
 0x54d   : > { %v1306_v42 = vmul.f32 %v2521_v26, %v1305_v63 }
 0x552   : > { %v1323_v2 = vpop.xlane.xlu1 %1322 }
 0x553   : > { %v1324_v48 = vsub.f32 0.0, %v1323_v2 }
 0x555   : > { %v1325_v6 = vmul.f32 %v2523_v55, %v1324_v48 }
 0x557   : > { %v1326_v20 = vadd.f32 %v1325_v6, %v1306_v42 }
 0x559   : > { %v1329_v9 = vsub.f32 %v1326_v20, %v1328_v4 }
 0x55b   : > { %1330 = vst [vmem:[#allocation12] sm:$0xff] %v1329_v9 }
 0x55c PF: > { %p2544_p11 = scmp.eq.s32.totalorder %s1473_s0, 2  ;;  %s1342_s27 = sshll.u32 %s2583_s8, 4  ;;  %s1343_s27 = int_to_ptr.hbm [resolvable:$true] %s1342_s27 }
 0x55d   : > { %s1924_s28 = smov [#allocation11]   ;;  %s1925_s30 = smov [#allocation12]  }
 0x55e   : > { %s1340_s29 = sshll.u32 %s1924_s28, 4  ;;  %s1354_s10 = sshll.u32 %s1925_s30, 4  ;;  %s1341_s29 = int_to_ptr.vmem [resolvable:$true] %s1340_s29  ;;  %s1355_s10 = int_to_ptr.vmem [resolvable:$true] %s1354_s10 }
 0x55f   : > { %1593 = dma.vmem_to_hbm [thread:$0]  (%p2544_p11), %s1341_s29, 640, %s1343_s27, [#allocation8]  }
 0x560   : > { %s1356_s12 = sshll.u32 %s2584_s9, 4  ;;  %s1357_s12 = int_to_ptr.hbm [resolvable:$true] %s1356_s12 }
 0x561   : > { %1595 = dma.vmem_to_hbm [thread:$0]  (%p2544_p11), %s1355_s10, 128, %s1357_s12, [#allocation13]  }
 0x562   : > { %1894 = dma.done.wait (%p2544_p11), [#allocation8], 640  }
 0x563   : > { %1896 = vsyncadd (%p2544_p11), [#allocation8], 4294966656 }
 0x564   : > { %1898 = dma.done.wait (%p2544_p11), [#allocation13], 128  }
 0x565   : > { %1900 = vsyncadd (%p2544_p11), [#allocation13], 4294967168 }
 0x566 PF: > { %s32_s15 = sadd.s32 1, %s1911_s15   ;;  %s2632_s13 = smov %s1907_s14 }
 0x567   : > { %p29_p12 = scmp.ge.s32.totalorder %s32_s15, 5   ;;  %s2633_s14 = smov %s2635_s16 }
 0x569   :  { %31 = sbr.rel (!%p29_p12) target bundleno = 11 (0xb), region = 129 }
 0x56e   :  { %1375 = vsyncpa [#allocation7], 1 }
 0x56f   :  { %1377 = vsyncpa [#allocation7 + $0x1], 1 }
 0x570   :  { %1378 = vsyncpa [#allocation10], 1 }
 0x571   :  { %1379 = vsyncpa [#allocation8], 1 }
 0x572   :  { %1381 = vsyncpa [#allocation8 + $0x1], 1 }
 0x573   :  { %1382 = vsyncpa [#allocation13], 1 }

</bundles_post_ra>
